<compile_context>
chip_gen: v7x
topology: tpu7x:2x2x1
jax: 0.10.0
libtpu: 0.0.40
codegen_flags: <defaults>
</compile_context>

<pallas_src>
import functools

import numpy as np
import jax
import jax.numpy as jnp
from jax import lax
from jax.experimental import pallas as pl
from jax.experimental.pallas import tpu as pltpu

EPS = 1e-8
NEG_SLOPE = 0.2


# --------------------------------- fused kernel --------------------------------
def _make_kernel(n_lil, blend):
    """Build the fused forward kernel for a static (top_blocks) configuration.

    Activation layout inside the kernel: (channels, batch*position) with positions on
    lanes (batch-major: lane index = b*L + l)."""
    n_exec = n_lil + (1 if blend else 0)

    def kernel(*refs):
        idx = 0

        def take(n=1):
            nonlocal idx
            out = refs[idx:idx + n]
            idx += n
            return out if n > 1 else out[0]

        if blend:
            ratio_ref = take()
        zT_ref = take()                                   # (latent, B) f32
        w_stack, qmat, m3, pmat, b_ct, wcat0, bc0 = take(7)
        masks = [take(2) for _ in range(n_exec + 1)]      # (notfirst, notlast) per level
        sels = [take(2) for _ in range(n_exec)]           # (sel_even, sel_odd) per step
        ublocks = [take(5) for _ in range(n_exec)]        # (we, wo, b1, w2cat, b2)
        w_lil, b_lil = take(2)
        if blend:
            w_big, b_big = take(2)
        out_ref = take()

        # ------------------------- small helpers (all values) -------------------
        def bf(x):
            return x.astype(jnp.bfloat16)

        def pixnorm(x):
            # pixelwise norm over channels (sublane-axis reduce -> EUP rsqrt)
            return x * lax.rsqrt(jnp.mean(x * x, axis=0, keepdims=True) + EPS)

        def lrelu(x):
            return jnp.maximum(x, NEG_SLOPE * x)

        def conv3(x, wcat_ref, b_ref, nf_ref, nl_ref):
            """conv1d(k=3, p=1): one tap-concatenated matmul + lane rolls + masks."""
            cout = b_ref.shape[0]
            n = x.shape[1]
            t = jnp.dot(wcat_ref[...], bf(x), preferred_element_type=jnp.float32)
            y = (pltpu.roll(t[:cout], shift=1, axis=1) * nf_ref[...]
                 + t[cout:2 * cout]
                 + pltpu.roll(t[2 * cout:], shift=n - 1, axis=1) * nl_ref[...])
            return y + b_ref[...]

        def up_conv(x, we_ref, wo_ref, b_ref, se_ref, so_ref, nf_ref, nl_ref):
            """nearest-x2 upsample fused (polyphase) into conv1d(k=3,p=1)."""
            cout = b_ref.shape[0]
            n = x.shape[1]
            xb = bf(x)
            te = jnp.dot(we_ref[...], xb, preferred_element_type=jnp.float32)
            to = jnp.dot(wo_ref[...], xb, preferred_element_type=jnp.float32)
            # even outputs: w0*x[l-1] + (w1+w2)*x[l] ; odd: (w0+w1)*x[l] + w2*x[l+1]
            even = pltpu.roll(te[:cout], shift=1, axis=1) * nf_ref[...] + te[cout:]
            odd = to[:cout] + pltpu.roll(to[cout:], shift=n - 1, axis=1) * nl_ref[...]
            y = (jnp.dot(bf(even), se_ref[...], preferred_element_type=jnp.float32)
                 + jnp.dot(bf(odd), so_ref[...], preferred_element_type=jnp.float32))
            return y + b_ref[...]

        def to_ecg(x, w_ref, b_ref):
            # 1x1 conv C -> 1, emitted lane-dense as a (1, B*L) row
            return jnp.dot(w_ref[...], bf(x), preferred_element_type=jnp.float32) + b_ref[...]

        # ---- blocks[0]: Pixnorm -> ConvT(latent->C0, k=init_res, length-1 input)
        #      -> LReLU -> Pixnorm -> Conv(k3,p1) -> LReLU -> Pixnorm
        z = pixnorm(zT_ref[...])                                            # (latent, B)
        t = jnp.dot(w_stack[...], bf(z), preferred_element_type=jnp.float32)   # (R*c0, B)
        t = jnp.dot(bf(t), qmat[...], preferred_element_type=jnp.float32)      # (R*c0, B*R)
        t = t * m3[...]                                                      # keep block l at lane b*R+l
        x = jnp.dot(pmat[...], bf(t), preferred_element_type=jnp.float32)    # (c0, B*R)
        x = x + b_ct[...]
        x = pixnorm(lrelu(x))
        nf0, nl0 = masks[0]
        x = conv3(x, wcat0, bc0, nf0, nl0)
        x = pixnorm(lrelu(x))

        # ---- up blocks 1..n_lil: upscaleConv -> Pixnorm -> LReLU -> Conv -> Pixnorm -> LReLU
        for k in range(n_lil):
            we, wo, b1, w2c, b2 = ublocks[k]
            nf_in, nl_in = masks[k]
            nf_out, nl_out = masks[k + 1]
            se, so = sels[k]
            x = up_conv(x, we, wo, b1, se, so, nf_in, nl_in)
            x = lrelu(pixnorm(x))
            x = conv3(x, w2c, b2, nf_out, nl_out)
            x = lrelu(pixnorm(x))

        if not blend:
            out_ref[...] = to_ecg(x, w_lil, b_lil)
        else:
            # big block (next up block) + its toECG
            we, wo, b1, w2c, b2 = ublocks[n_lil]
            nf_in, nl_in = masks[n_lil]
            nf_out, nl_out = masks[n_lil + 1]
            se, so = sels[n_lil]
            y = up_conv(x, we, wo, b1, se, so, nf_in, nl_in)
            y = lrelu(pixnorm(y))
            y = conv3(y, w2c, b2, nf_out, nl_out)
            y = lrelu(pixnorm(y))
            new_row = to_ecg(y, w_big, b_big)                 # (1, B*2L)
            # lil toECG at the LOW resolution, then nearest-x2 duplicate on lanes
            trained = to_ecg(x, w_lil, b_lil)                 # (1, B*L)
            tb = bf(trained)
            trained_x2 = (jnp.dot(tb, se[...], preferred_element_type=jnp.float32)
                          + jnp.dot(tb, so[...], preferred_element_type=jnp.float32))
            r = ratio_ref[0]
            out_ref[...] = r * new_row + (1.0 - r) * trained_x2

    return kernel


# ------------------------------- Generator wrapper -----------------------------
@functools.partial(jax.jit, static_argnames=("top_blocks",))
def generator_forward(params, latent, top_blocks, blend_ratio):
    """latent: (B, latent_dim, 1) (PyTorch NCW).  top_blocks: static tuple of 1 or 2
    block indices (as in the PyTorch forward).  Returns NCW (B, 1, L) ECG."""
    B, latent_dim = latent.shape[0], latent.shape[1]
    zT = latent.reshape(B, latent_dim).T.astype(jnp.float32)      # (latent, B)

    p0 = params["block0"]
    R, _, c0 = p0["w_ct"].shape
    n_lil = top_blocks[0]
    blend = len(top_blocks) == 2
    if blend:
        assert top_blocks[1] == top_blocks[0] + 1
    n_exec = n_lil + (1 if blend else 0)
    bf16 = jnp.bfloat16

    inputs, specs = [], []

    def add(x, smem=False):
        inputs.append(x)
        specs.append(pl.BlockSpec(memory_space=(
            pltpu.MemorySpace.SMEM if smem else pltpu.MemorySpace.VMEM)))

    if blend:
        add(jnp.reshape(jnp.asarray(blend_ratio, jnp.float32), (1,)), smem=True)
    add(zT)

    # ---- block0 weights + layout-fix constants ----------------------------------
    # w_stack[l*c0 + c, ci] = w_ct[l, ci, c]
    w_stack = jnp.transpose(p0["w_ct"], (0, 2, 1)).reshape(R * c0, latent_dim)
    qmat = np.zeros((B, B * R), np.float32)                   # Q[b, b*R+l] = 1
    for b in range(B):
        qmat[b, b * R:(b + 1) * R] = 1.0
    jj = np.arange(R * c0)[:, None]
    rr = np.arange(B * R)[None, :]
    m3 = ((jj // c0) == (rr % R)).astype(np.float32)          # keep block l at lane b*R+l
    pmat = np.zeros((c0, R * c0), np.float32)                 # collapse: P[c, l*c0+c] = 1
    for l in range(R):
        pmat[np.arange(c0), l * c0 + np.arange(c0)] = 1.0
    wcat0 = jnp.transpose(p0["w_c"], (0, 2, 1)).reshape(3 * c0, c0)
    add(w_stack.astype(bf16))
    add(jnp.asarray(qmat, bf16))
    add(jnp.asarray(m3, jnp.float32))
    add(jnp.asarray(pmat, bf16))
    add(p0["b_ct"].T.astype(jnp.float32))                     # (c0, 1)
    add(wcat0.astype(bf16))
    add(p0["b_c"].T.astype(jnp.float32))                      # (c0, 1)

    # ---- per-level boundary masks (levels 0..n_exec) -----------------------------
    for k in range(n_exec + 1):
        L = R * (2 ** k)
        pos = np.arange(B * L) % L
        add(jnp.asarray((pos != 0).astype(np.float32).reshape(1, B * L)))
        add(jnp.asarray((pos != L - 1).astype(np.float32).reshape(1, B * L)))

    # ---- per-step even/odd interleave selection matrices (steps 1..n_exec) -------
    for k in range(1, n_exec + 1):
        L = R * (2 ** (k - 1))
        se = np.zeros((B * L, 2 * B * L), np.float32)
        so = np.zeros((B * L, 2 * B * L), np.float32)
        for b in range(B):
            for l in range(L):
                se[b * L + l, b * 2 * L + 2 * l] = 1.0
                so[b * L + l, b * 2 * L + 2 * l + 1] = 1.0
        add(jnp.asarray(se, bf16))
        add(jnp.asarray(so, bf16))

    # ---- up-block weights: polyphase-folded first conv + tap-concatenated second --
    for bi in range(1, n_exec + 1):
        pu = params["up_blocks"][bi - 1]
        w1 = pu["w1"]                                          # (3, Cin, Cout)
        cout = w1.shape[2]
        we = jnp.concatenate([w1[0].T, (w1[1] + w1[2]).T], axis=0)   # (2Cout, Cin)
        wo = jnp.concatenate([(w1[0] + w1[1]).T, w1[2].T], axis=0)   # (2Cout, Cin)
        w2c = jnp.transpose(pu["w2"], (0, 2, 1)).reshape(3 * cout, cout)
        add(we.astype(bf16))
        add(wo.astype(bf16))
        add(pu["b1"].T.astype(jnp.float32))                    # (Cout, 1)
        add(w2c.astype(bf16))
        add(pu["b2"].T.astype(jnp.float32))                    # (Cout, 1)

    lil = params["to_ecg"][top_blocks[0]]
    add(lil["w"].astype(bf16))
    add(lil["b"].astype(jnp.float32))
    if blend:
        big = params["to_ecg"][top_blocks[1]]
        add(big["w"].astype(bf16))
        add(big["b"].astype(jnp.float32))

    L_out = R * (2 ** n_exec)
    row = pl.pallas_call(
        _make_kernel(n_lil, blend),
        out_shape=jax.ShapeDtypeStruct((1, B * L_out), jnp.float32),
        in_specs=specs,
        out_specs=pl.BlockSpec(memory_space=pltpu.MemorySpace.VMEM),
    )(*inputs)
    # Row is b-major (lane index = b*L_out + l): reshape to NCW (B, 1, L_out) is free.
    return row.reshape(B, 1, L_out)


# --------------------------------- param init ----------------------------------
def init_params(key, latent_dim, blocks, init_res):
    keys = iter(jax.random.split(key, 64))

    def nrm(shape):
        return jax.random.normal(next(keys), shape, dtype=jnp.float32)

    c0 = blocks[0]
    # Equalized-LR scale baked into stored weights: sqrt(2 / fan_in).
    params = {
        "block0": dict(
            w_ct=nrm((init_res, latent_dim, c0)) * (2.0 / (latent_dim * init_res)) ** 0.5,
            b_ct=nrm((1, c0)) * 0.1,
            w_c=nrm((3, c0, c0)) * (2.0 / (c0 * 3)) ** 0.5,
            b_c=nrm((1, c0)) * 0.1,
        )
    }
    up = []
    for i in range(1, len(blocks)):
        cin, cout = blocks[i - 1], blocks[i]
        up.append(dict(
            w1=nrm((3, cin, cout)) * (2.0 / (cin * 3)) ** 0.5,
            b1=nrm((1, cout)) * 0.1,
            w2=nrm((3, cout, cout)) * (2.0 / (cout * 3)) ** 0.5,
            b2=nrm((1, cout)) * 0.1,
        ))
    params["up_blocks"] = up
    params["to_ecg"] = [
        dict(w=nrm((1, c)) * (2.0 / c) ** 0.5, b=nrm((1, 1)) * 0.1) for c in blocks
    ]
    return params


if __name__ == "__main__":
    LATENT_DIM, BLOCKS, INIT_RES, B = 32, (32, 16, 16), 8, 4   # B=4 -> 128-lane output
    key = jax.random.PRNGKey(0)
    pkey, lkey = jax.random.split(key)
    params = init_params(pkey, LATENT_DIM, BLOCKS, INIT_RES)
    latent = jax.random.normal(lkey, (B, LATENT_DIM, 1), dtype=jnp.float32)  # NCW like PyTorch

    # Blend (progressive-growing) path: lil block = 1, big block = 2.
    out_blend = generator_forward(params, latent, (1, 2), 0.3)
    # Stable path: only the top block.
    out_single = generator_forward(params, latent, (2,), 0.0)

    jax.block_until_ready((out_blend, out_single))
    assert out_blend.shape == (B, 1, INIT_RES * 4)
    assert out_single.shape == (B, 1, INIT_RES * 4)
    assert bool(jnp.all(jnp.isfinite(out_blend))) and bool(jnp.all(jnp.isfinite(out_single)))
    print("KERNEL_OK")
</pallas_src>

<mosaic_0001>
module attributes {stable_mosaic.version = 11 : i64} {
  func.func @kernel(%arg0: memref<1xf32, #tpu.memory_space<smem>>, %arg1: memref<32x4xf32, #tpu.memory_space<vmem>>, %arg2: memref<256x32xbf16, #tpu.memory_space<vmem>>, %arg3: memref<4x32xbf16, #tpu.memory_space<vmem>>, %arg4: memref<256x32xf32, #tpu.memory_space<vmem>>, %arg5: memref<32x256xbf16, #tpu.memory_space<vmem>>, %arg6: memref<32x1xf32, #tpu.memory_space<vmem>>, %arg7: memref<96x32xbf16, #tpu.memory_space<vmem>>, %arg8: memref<32x1xf32, #tpu.memory_space<vmem>>, %arg9: memref<1x32xf32, #tpu.memory_space<vmem>>, %arg10: memref<1x32xf32, #tpu.memory_space<vmem>>, %arg11: memref<1x64xf32, #tpu.memory_space<vmem>>, %arg12: memref<1x64xf32, #tpu.memory_space<vmem>>, %arg13: memref<1x128xf32, #tpu.memory_space<vmem>>, %arg14: memref<1x128xf32, #tpu.memory_space<vmem>>, %arg15: memref<32x64xbf16, #tpu.memory_space<vmem>>, %arg16: memref<32x64xbf16, #tpu.memory_space<vmem>>, %arg17: memref<64x128xbf16, #tpu.memory_space<vmem>>, %arg18: memref<64x128xbf16, #tpu.memory_space<vmem>>, %arg19: memref<32x32xbf16, #tpu.memory_space<vmem>>, %arg20: memref<32x32xbf16, #tpu.memory_space<vmem>>, %arg21: memref<16x1xf32, #tpu.memory_space<vmem>>, %arg22: memref<48x16xbf16, #tpu.memory_space<vmem>>, %arg23: memref<16x1xf32, #tpu.memory_space<vmem>>, %arg24: memref<32x16xbf16, #tpu.memory_space<vmem>>, %arg25: memref<32x16xbf16, #tpu.memory_space<vmem>>, %arg26: memref<16x1xf32, #tpu.memory_space<vmem>>, %arg27: memref<48x16xbf16, #tpu.memory_space<vmem>>, %arg28: memref<16x1xf32, #tpu.memory_space<vmem>>, %arg29: memref<1x16xbf16, #tpu.memory_space<vmem>>, %arg30: memref<1x1xf32, #tpu.memory_space<vmem>>, %arg31: memref<1x16xbf16, #tpu.memory_space<vmem>>, %arg32: memref<1x1xf32, #tpu.memory_space<vmem>>, %arg33: memref<1x128xf32, #tpu.memory_space<vmem>>) attributes {dimension_semantics = [], scalar_prefetch = 0 : i64, scratch_operands = 0 : i64, tpu.core_type = #tpu.core_type<tc>} {
    %c0 = arith.constant 0 : index
    %c0_0 = arith.constant 0 : index
    %0 = vector.load %arg1[%c0, %c0_0] : memref<32x4xf32, #tpu.memory_space<vmem>>, vector<32x4xf32>
    %1 = arith.mulf %0, %0 : vector<32x4xf32>
    %cst = arith.constant dense<0.000000e+00> : vector<4xf32>
    %2 = vector.multi_reduction <add>, %1, %cst [0] : vector<32x4xf32> to vector<4xf32>
    %3 = vector.shape_cast %2 : vector<4xf32> to vector<1x4xf32>
    %cst_1 = arith.constant 3.200000e+01 : f32
    %4 = vector.broadcast %cst_1 : f32 to vector<1x4xf32>
    %5 = arith.divf %3, %4 : vector<1x4xf32>
    %cst_2 = arith.constant 9.99999993E-9 : f32
    %6 = vector.broadcast %cst_2 : f32 to vector<1x4xf32>
    %7 = arith.addf %5, %6 : vector<1x4xf32>
    %8 = math.rsqrt %7 : vector<1x4xf32>
    %9 = vector.broadcast %8 : vector<1x4xf32> to vector<32x4xf32>
    %10 = arith.mulf %0, %9 : vector<32x4xf32>
    %c0_3 = arith.constant 0 : index
    %c0_4 = arith.constant 0 : index
    %11 = vector.load %arg2[%c0_3, %c0_4] : memref<256x32xbf16, #tpu.memory_space<vmem>>, vector<256x32xbf16>
    %12 = arith.truncf %10 : vector<32x4xf32> to vector<32x4xbf16>
    %cst_5 = arith.constant dense<0.000000e+00> : vector<256x4xf32>
    %13 = tpu.matmul %11, %12, %cst_5 {dimension_numbers = #tpu.dot_dimension_numbers<[1], [0], [0], [1], [0, 0, 1, 1], [], []>} : vector<256x32xbf16>, vector<32x4xbf16>, vector<256x4xf32> -> vector<256x4xf32>
    %14 = arith.truncf %13 : vector<256x4xf32> to vector<256x4xbf16>
    %c0_6 = arith.constant 0 : index
    %c0_7 = arith.constant 0 : index
    %15 = vector.load %arg3[%c0_6, %c0_7] : memref<4x32xbf16, #tpu.memory_space<vmem>>, vector<4x32xbf16>
    %cst_8 = arith.constant dense<0.000000e+00> : vector<256x32xf32>
    %16 = tpu.matmul %14, %15, %cst_8 {dimension_numbers = #tpu.dot_dimension_numbers<[1], [0], [0], [1], [0, 0, 1, 1], [], []>} : vector<256x4xbf16>, vector<4x32xbf16>, vector<256x32xf32> -> vector<256x32xf32>
    %c0_9 = arith.constant 0 : index
    %c0_10 = arith.constant 0 : index
    %17 = vector.load %arg4[%c0_9, %c0_10] : memref<256x32xf32, #tpu.memory_space<vmem>>, vector<256x32xf32>
    %18 = arith.mulf %16, %17 : vector<256x32xf32>
    %c0_11 = arith.constant 0 : index
    %c0_12 = arith.constant 0 : index
    %19 = vector.load %arg5[%c0_11, %c0_12] : memref<32x256xbf16, #tpu.memory_space<vmem>>, vector<32x256xbf16>
    %20 = arith.truncf %18 : vector<256x32xf32> to vector<256x32xbf16>
    %cst_13 = arith.constant dense<0.000000e+00> : vector<32x32xf32>
    %21 = tpu.matmul %19, %20, %cst_13 {dimension_numbers = #tpu.dot_dimension_numbers<[1], [0], [0], [1], [0, 0, 1, 1], [], []>} : vector<32x256xbf16>, vector<256x32xbf16>, vector<32x32xf32> -> vector<32x32xf32>
    %c0_14 = arith.constant 0 : index
    %c0_15 = arith.constant 0 : index
    %22 = vector.load %arg6[%c0_14, %c0_15] : memref<32x1xf32, #tpu.memory_space<vmem>>, vector<32x1xf32>
    %23 = vector.broadcast %22 : vector<32x1xf32> to vector<32x32xf32>
    %24 = arith.addf %21, %23 : vector<32x32xf32>
    %cst_16 = arith.constant 2.000000e-01 : f32
    %25 = vector.broadcast %cst_16 : f32 to vector<32x32xf32>
    %26 = arith.mulf %25, %24 : vector<32x32xf32>
    %27 = arith.maximumf %24, %26 : vector<32x32xf32>
    %28 = arith.mulf %27, %27 : vector<32x32xf32>
    %cst_17 = arith.constant dense<0.000000e+00> : vector<32xf32>
    %29 = vector.multi_reduction <add>, %28, %cst_17 [0] : vector<32x32xf32> to vector<32xf32>
    %30 = vector.shape_cast %29 : vector<32xf32> to vector<1x32xf32>
    %cst_18 = arith.constant 3.200000e+01 : f32
    %31 = vector.broadcast %cst_18 : f32 to vector<1x32xf32>
    %32 = arith.divf %30, %31 : vector<1x32xf32>
    %cst_19 = arith.constant 9.99999993E-9 : f32
    %33 = vector.broadcast %cst_19 : f32 to vector<1x32xf32>
    %34 = arith.addf %32, %33 : vector<1x32xf32>
    %35 = math.rsqrt %34 : vector<1x32xf32>
    %36 = vector.broadcast %35 : vector<1x32xf32> to vector<32x32xf32>
    %37 = arith.mulf %27, %36 : vector<32x32xf32>
    %c0_20 = arith.constant 0 : index
    %c0_21 = arith.constant 0 : index
    %38 = vector.load %arg7[%c0_20, %c0_21] : memref<96x32xbf16, #tpu.memory_space<vmem>>, vector<96x32xbf16>
    %39 = arith.truncf %37 : vector<32x32xf32> to vector<32x32xbf16>
    %cst_22 = arith.constant dense<0.000000e+00> : vector<96x32xf32>
    %40 = tpu.matmul %38, %39, %cst_22 {dimension_numbers = #tpu.dot_dimension_numbers<[1], [0], [0], [1], [0, 0, 1, 1], [], []>} : vector<96x32xbf16>, vector<32x32xbf16>, vector<96x32xf32> -> vector<96x32xf32>
    %41 = vector.extract_strided_slice %40 {offsets = [0, 0], sizes = [32, 32], strides = [1, 1]} : vector<96x32xf32> to vector<32x32xf32>
    %c1_i32 = arith.constant 1 : i32
    %42 = tpu.dynamic_rotate %41 by %c1_i32 dim 1 : vector<32x32xf32>, i32 -> vector<32x32xf32>
    %c0_23 = arith.constant 0 : index
    %c0_24 = arith.constant 0 : index
    %43 = vector.load %arg9[%c0_23, %c0_24] : memref<1x32xf32, #tpu.memory_space<vmem>>, vector<1x32xf32>
    %44 = vector.broadcast %43 : vector<1x32xf32> to vector<32x32xf32>
    %45 = arith.mulf %42, %44 : vector<32x32xf32>
    %46 = vector.extract_strided_slice %40 {offsets = [32, 0], sizes = [32, 32], strides = [1, 1]} : vector<96x32xf32> to vector<32x32xf32>
    %47 = arith.addf %45, %46 : vector<32x32xf32>
    %48 = vector.extract_strided_slice %40 {offsets = [64, 0], sizes = [32, 32], strides = [1, 1]} : vector<96x32xf32> to vector<32x32xf32>
    %c31_i32 = arith.constant 31 : i32
    %49 = tpu.dynamic_rotate %48 by %c31_i32 dim 1 : vector<32x32xf32>, i32 -> vector<32x32xf32>
    %c0_25 = arith.constant 0 : index
    %c0_26 = arith.constant 0 : index
    %50 = vector.load %arg10[%c0_25, %c0_26] : memref<1x32xf32, #tpu.memory_space<vmem>>, vector<1x32xf32>
    %51 = vector.broadcast %50 : vector<1x32xf32> to vector<32x32xf32>
    %52 = arith.mulf %49, %51 : vector<32x32xf32>
    %53 = arith.addf %47, %52 : vector<32x32xf32>
    %c0_27 = arith.constant 0 : index
    %c0_28 = arith.constant 0 : index
    %54 = vector.load %arg8[%c0_27, %c0_28] : memref<32x1xf32, #tpu.memory_space<vmem>>, vector<32x1xf32>
    %55 = vector.broadcast %54 : vector<32x1xf32> to vector<32x32xf32>
    %56 = arith.addf %53, %55 : vector<32x32xf32>
    %cst_29 = arith.constant 2.000000e-01 : f32
    %57 = vector.broadcast %cst_29 : f32 to vector<32x32xf32>
    %58 = arith.mulf %57, %56 : vector<32x32xf32>
    %59 = arith.maximumf %56, %58 : vector<32x32xf32>
    %60 = arith.mulf %59, %59 : vector<32x32xf32>
    %cst_30 = arith.constant dense<0.000000e+00> : vector<32xf32>
    %61 = vector.multi_reduction <add>, %60, %cst_30 [0] : vector<32x32xf32> to vector<32xf32>
    %62 = vector.shape_cast %61 : vector<32xf32> to vector<1x32xf32>
    %cst_31 = arith.constant 3.200000e+01 : f32
    %63 = vector.broadcast %cst_31 : f32 to vector<1x32xf32>
    %64 = arith.divf %62, %63 : vector<1x32xf32>
    %cst_32 = arith.constant 9.99999993E-9 : f32
    %65 = vector.broadcast %cst_32 : f32 to vector<1x32xf32>
    %66 = arith.addf %64, %65 : vector<1x32xf32>
    %67 = math.rsqrt %66 : vector<1x32xf32>
    %68 = vector.broadcast %67 : vector<1x32xf32> to vector<32x32xf32>
    %69 = arith.mulf %59, %68 : vector<32x32xf32>
    %70 = arith.truncf %69 : vector<32x32xf32> to vector<32x32xbf16>
    %c0_33 = arith.constant 0 : index
    %c0_34 = arith.constant 0 : index
    %71 = vector.load %arg19[%c0_33, %c0_34] : memref<32x32xbf16, #tpu.memory_space<vmem>>, vector<32x32xbf16>
    %cst_35 = arith.constant dense<0.000000e+00> : vector<32x32xf32>
    %72 = tpu.matmul %71, %70, %cst_35 {dimension_numbers = #tpu.dot_dimension_numbers<[1], [0], [0], [1], [0, 0, 1, 1], [], []>} : vector<32x32xbf16>, vector<32x32xbf16>, vector<32x32xf32> -> vector<32x32xf32>
    %c0_36 = arith.constant 0 : index
    %c0_37 = arith.constant 0 : index
    %73 = vector.load %arg20[%c0_36, %c0_37] : memref<32x32xbf16, #tpu.memory_space<vmem>>, vector<32x32xbf16>
    %cst_38 = arith.constant dense<0.000000e+00> : vector<32x32xf32>
    %74 = tpu.matmul %73, %70, %cst_38 {dimension_numbers = #tpu.dot_dimension_numbers<[1], [0], [0], [1], [0, 0, 1, 1], [], []>} : vector<32x32xbf16>, vector<32x32xbf16>, vector<32x32xf32> -> vector<32x32xf32>
    %75 = vector.extract_strided_slice %72 {offsets = [0, 0], sizes = [16, 32], strides = [1, 1]} : vector<32x32xf32> to vector<16x32xf32>
    %c1_i32_39 = arith.constant 1 : i32
    %76 = tpu.dynamic_rotate %75 by %c1_i32_39 dim 1 : vector<16x32xf32>, i32 -> vector<16x32xf32>
    %c0_40 = arith.constant 0 : index
    %c0_41 = arith.constant 0 : index
    %77 = vector.load %arg9[%c0_40, %c0_41] : memref<1x32xf32, #tpu.memory_space<vmem>>, vector<1x32xf32>
    %78 = vector.broadcast %77 : vector<1x32xf32> to vector<16x32xf32>
    %79 = arith.mulf %76, %78 : vector<16x32xf32>
    %80 = vector.extract_strided_slice %72 {offsets = [16, 0], sizes = [16, 32], strides = [1, 1]} : vector<32x32xf32> to vector<16x32xf32>
    %81 = arith.addf %79, %80 : vector<16x32xf32>
    %82 = vector.extract_strided_slice %74 {offsets = [0, 0], sizes = [16, 32], strides = [1, 1]} : vector<32x32xf32> to vector<16x32xf32>
    %83 = vector.extract_strided_slice %74 {offsets = [16, 0], sizes = [16, 32], strides = [1, 1]} : vector<32x32xf32> to vector<16x32xf32>
    %c31_i32_42 = arith.constant 31 : i32
    %84 = tpu.dynamic_rotate %83 by %c31_i32_42 dim 1 : vector<16x32xf32>, i32 -> vector<16x32xf32>
    %c0_43 = arith.constant 0 : index
    %c0_44 = arith.constant 0 : index
    %85 = vector.load %arg10[%c0_43, %c0_44] : memref<1x32xf32, #tpu.memory_space<vmem>>, vector<1x32xf32>
    %86 = vector.broadcast %85 : vector<1x32xf32> to vector<16x32xf32>
    %87 = arith.mulf %84, %86 : vector<16x32xf32>
    %88 = arith.addf %82, %87 : vector<16x32xf32>
    %89 = arith.truncf %81 : vector<16x32xf32> to vector<16x32xbf16>
    %c0_45 = arith.constant 0 : index
    %c0_46 = arith.constant 0 : index
    %90 = vector.load %arg15[%c0_45, %c0_46] : memref<32x64xbf16, #tpu.memory_space<vmem>>, vector<32x64xbf16>
    %cst_47 = arith.constant dense<0.000000e+00> : vector<16x64xf32>
    %91 = tpu.matmul %89, %90, %cst_47 {dimension_numbers = #tpu.dot_dimension_numbers<[1], [0], [0], [1], [0, 0, 1, 1], [], []>} : vector<16x32xbf16>, vector<32x64xbf16>, vector<16x64xf32> -> vector<16x64xf32>
    %92 = arith.truncf %88 : vector<16x32xf32> to vector<16x32xbf16>
    %c0_48 = arith.constant 0 : index
    %c0_49 = arith.constant 0 : index
    %93 = vector.load %arg16[%c0_48, %c0_49] : memref<32x64xbf16, #tpu.memory_space<vmem>>, vector<32x64xbf16>
    %cst_50 = arith.constant dense<0.000000e+00> : vector<16x64xf32>
    %94 = tpu.matmul %92, %93, %cst_50 {dimension_numbers = #tpu.dot_dimension_numbers<[1], [0], [0], [1], [0, 0, 1, 1], [], []>} : vector<16x32xbf16>, vector<32x64xbf16>, vector<16x64xf32> -> vector<16x64xf32>
    %95 = arith.addf %91, %94 : vector<16x64xf32>
    %c0_51 = arith.constant 0 : index
    %c0_52 = arith.constant 0 : index
    %96 = vector.load %arg21[%c0_51, %c0_52] : memref<16x1xf32, #tpu.memory_space<vmem>>, vector<16x1xf32>
    %97 = vector.broadcast %96 : vector<16x1xf32> to vector<16x64xf32>
    %98 = arith.addf %95, %97 : vector<16x64xf32>
    %99 = arith.mulf %98, %98 : vector<16x64xf32>
    %cst_53 = arith.constant dense<0.000000e+00> : vector<64xf32>
    %100 = vector.multi_reduction <add>, %99, %cst_53 [0] : vector<16x64xf32> to vector<64xf32>
    %101 = vector.shape_cast %100 : vector<64xf32> to vector<1x64xf32>
    %cst_54 = arith.constant 1.600000e+01 : f32
    %102 = vector.broadcast %cst_54 : f32 to vector<1x64xf32>
    %103 = arith.divf %101, %102 : vector<1x64xf32>
    %cst_55 = arith.constant 9.99999993E-9 : f32
    %104 = vector.broadcast %cst_55 : f32 to vector<1x64xf32>
    %105 = arith.addf %103, %104 : vector<1x64xf32>
    %106 = math.rsqrt %105 : vector<1x64xf32>
    %107 = vector.broadcast %106 : vector<1x64xf32> to vector<16x64xf32>
    %108 = arith.mulf %98, %107 : vector<16x64xf32>
    %cst_56 = arith.constant 2.000000e-01 : f32
    %109 = vector.broadcast %cst_56 : f32 to vector<16x64xf32>
    %110 = arith.mulf %109, %108 : vector<16x64xf32>
    %111 = arith.maximumf %108, %110 : vector<16x64xf32>
    %c0_57 = arith.constant 0 : index
    %c0_58 = arith.constant 0 : index
    %112 = vector.load %arg22[%c0_57, %c0_58] : memref<48x16xbf16, #tpu.memory_space<vmem>>, vector<48x16xbf16>
    %113 = arith.truncf %111 : vector<16x64xf32> to vector<16x64xbf16>
    %cst_59 = arith.constant dense<0.000000e+00> : vector<48x64xf32>
    %114 = tpu.matmul %112, %113, %cst_59 {dimension_numbers = #tpu.dot_dimension_numbers<[1], [0], [0], [1], [0, 0, 1, 1], [], []>} : vector<48x16xbf16>, vector<16x64xbf16>, vector<48x64xf32> -> vector<48x64xf32>
    %115 = vector.extract_strided_slice %114 {offsets = [0, 0], sizes = [16, 64], strides = [1, 1]} : vector<48x64xf32> to vector<16x64xf32>
    %c1_i32_60 = arith.constant 1 : i32
    %116 = tpu.dynamic_rotate %115 by %c1_i32_60 dim 1 : vector<16x64xf32>, i32 -> vector<16x64xf32>
    %c0_61 = arith.constant 0 : index
    %c0_62 = arith.constant 0 : index
    %117 = vector.load %arg11[%c0_61, %c0_62] : memref<1x64xf32, #tpu.memory_space<vmem>>, vector<1x64xf32>
    %118 = vector.broadcast %117 : vector<1x64xf32> to vector<16x64xf32>
    %119 = arith.mulf %116, %118 : vector<16x64xf32>
    %120 = vector.extract_strided_slice %114 {offsets = [16, 0], sizes = [16, 64], strides = [1, 1]} : vector<48x64xf32> to vector<16x64xf32>
    %121 = arith.addf %119, %120 : vector<16x64xf32>
    %122 = vector.extract_strided_slice %114 {offsets = [32, 0], sizes = [16, 64], strides = [1, 1]} : vector<48x64xf32> to vector<16x64xf32>
    %c63_i32 = arith.constant 63 : i32
    %123 = tpu.dynamic_rotate %122 by %c63_i32 dim 1 : vector<16x64xf32>, i32 -> vector<16x64xf32>
    %c0_63 = arith.constant 0 : index
    %c0_64 = arith.constant 0 : index
    %124 = vector.load %arg12[%c0_63, %c0_64] : memref<1x64xf32, #tpu.memory_space<vmem>>, vector<1x64xf32>
    %125 = vector.broadcast %124 : vector<1x64xf32> to vector<16x64xf32>
    %126 = arith.mulf %123, %125 : vector<16x64xf32>
    %127 = arith.addf %121, %126 : vector<16x64xf32>
    %c0_65 = arith.constant 0 : index
    %c0_66 = arith.constant 0 : index
    %128 = vector.load %arg23[%c0_65, %c0_66] : memref<16x1xf32, #tpu.memory_space<vmem>>, vector<16x1xf32>
    %129 = vector.broadcast %128 : vector<16x1xf32> to vector<16x64xf32>
    %130 = arith.addf %127, %129 : vector<16x64xf32>
    %131 = arith.mulf %130, %130 : vector<16x64xf32>
    %cst_67 = arith.constant dense<0.000000e+00> : vector<64xf32>
    %132 = vector.multi_reduction <add>, %131, %cst_67 [0] : vector<16x64xf32> to vector<64xf32>
    %133 = vector.shape_cast %132 : vector<64xf32> to vector<1x64xf32>
    %cst_68 = arith.constant 1.600000e+01 : f32
    %134 = vector.broadcast %cst_68 : f32 to vector<1x64xf32>
    %135 = arith.divf %133, %134 : vector<1x64xf32>
    %cst_69 = arith.constant 9.99999993E-9 : f32
    %136 = vector.broadcast %cst_69 : f32 to vector<1x64xf32>
    %137 = arith.addf %135, %136 : vector<1x64xf32>
    %138 = math.rsqrt %137 : vector<1x64xf32>
    %139 = vector.broadcast %138 : vector<1x64xf32> to vector<16x64xf32>
    %140 = arith.mulf %130, %139 : vector<16x64xf32>
    %cst_70 = arith.constant 2.000000e-01 : f32
    %141 = vector.broadcast %cst_70 : f32 to vector<16x64xf32>
    %142 = arith.mulf %141, %140 : vector<16x64xf32>
    %143 = arith.maximumf %140, %142 : vector<16x64xf32>
    %144 = arith.truncf %143 : vector<16x64xf32> to vector<16x64xbf16>
    %c0_71 = arith.constant 0 : index
    %c0_72 = arith.constant 0 : index
    %145 = vector.load %arg24[%c0_71, %c0_72] : memref<32x16xbf16, #tpu.memory_space<vmem>>, vector<32x16xbf16>
    %cst_73 = arith.constant dense<0.000000e+00> : vector<32x64xf32>
    %146 = tpu.matmul %145, %144, %cst_73 {dimension_numbers = #tpu.dot_dimension_numbers<[1], [0], [0], [1], [0, 0, 1, 1], [], []>} : vector<32x16xbf16>, vector<16x64xbf16>, vector<32x64xf32> -> vector<32x64xf32>
    %c0_74 = arith.constant 0 : index
    %c0_75 = arith.constant 0 : index
    %147 = vector.load %arg25[%c0_74, %c0_75] : memref<32x16xbf16, #tpu.memory_space<vmem>>, vector<32x16xbf16>
    %cst_76 = arith.constant dense<0.000000e+00> : vector<32x64xf32>
    %148 = tpu.matmul %147, %144, %cst_76 {dimension_numbers = #tpu.dot_dimension_numbers<[1], [0], [0], [1], [0, 0, 1, 1], [], []>} : vector<32x16xbf16>, vector<16x64xbf16>, vector<32x64xf32> -> vector<32x64xf32>
    %149 = vector.extract_strided_slice %146 {offsets = [0, 0], sizes = [16, 64], strides = [1, 1]} : vector<32x64xf32> to vector<16x64xf32>
    %c1_i32_77 = arith.constant 1 : i32
    %150 = tpu.dynamic_rotate %149 by %c1_i32_77 dim 1 : vector<16x64xf32>, i32 -> vector<16x64xf32>
    %c0_78 = arith.constant 0 : index
    %c0_79 = arith.constant 0 : index
    %151 = vector.load %arg11[%c0_78, %c0_79] : memref<1x64xf32, #tpu.memory_space<vmem>>, vector<1x64xf32>
    %152 = vector.broadcast %151 : vector<1x64xf32> to vector<16x64xf32>
    %153 = arith.mulf %150, %152 : vector<16x64xf32>
    %154 = vector.extract_strided_slice %146 {offsets = [16, 0], sizes = [16, 64], strides = [1, 1]} : vector<32x64xf32> to vector<16x64xf32>
    %155 = arith.addf %153, %154 : vector<16x64xf32>
    %156 = vector.extract_strided_slice %148 {offsets = [0, 0], sizes = [16, 64], strides = [1, 1]} : vector<32x64xf32> to vector<16x64xf32>
    %157 = vector.extract_strided_slice %148 {offsets = [16, 0], sizes = [16, 64], strides = [1, 1]} : vector<32x64xf32> to vector<16x64xf32>
    %c63_i32_80 = arith.constant 63 : i32
    %158 = tpu.dynamic_rotate %157 by %c63_i32_80 dim 1 : vector<16x64xf32>, i32 -> vector<16x64xf32>
    %c0_81 = arith.constant 0 : index
    %c0_82 = arith.constant 0 : index
    %159 = vector.load %arg12[%c0_81, %c0_82] : memref<1x64xf32, #tpu.memory_space<vmem>>, vector<1x64xf32>
    %160 = vector.broadcast %159 : vector<1x64xf32> to vector<16x64xf32>
    %161 = arith.mulf %158, %160 : vector<16x64xf32>
    %162 = arith.addf %156, %161 : vector<16x64xf32>
    %163 = arith.truncf %155 : vector<16x64xf32> to vector<16x64xbf16>
    %c0_83 = arith.constant 0 : index
    %c0_84 = arith.constant 0 : index
    %164 = vector.load %arg17[%c0_83, %c0_84] : memref<64x128xbf16, #tpu.memory_space<vmem>>, vector<64x128xbf16>
    %cst_85 = arith.constant dense<0.000000e+00> : vector<16x128xf32>
    %165 = tpu.matmul %163, %164, %cst_85 {dimension_numbers = #tpu.dot_dimension_numbers<[1], [0], [0], [1], [0, 0, 1, 1], [], []>} : vector<16x64xbf16>, vector<64x128xbf16>, vector<16x128xf32> -> vector<16x128xf32>
    %166 = arith.truncf %162 : vector<16x64xf32> to vector<16x64xbf16>
    %c0_86 = arith.constant 0 : index
    %c0_87 = arith.constant 0 : index
    %167 = vector.load %arg18[%c0_86, %c0_87] : memref<64x128xbf16, #tpu.memory_space<vmem>>, vector<64x128xbf16>
    %cst_88 = arith.constant dense<0.000000e+00> : vector<16x128xf32>
    %168 = tpu.matmul %166, %167, %cst_88 {dimension_numbers = #tpu.dot_dimension_numbers<[1], [0], [0], [1], [0, 0, 1, 1], [], []>} : vector<16x64xbf16>, vector<64x128xbf16>, vector<16x128xf32> -> vector<16x128xf32>
    %169 = arith.addf %165, %168 : vector<16x128xf32>
    %c0_89 = arith.constant 0 : index
    %c0_90 = arith.constant 0 : index
    %170 = vector.load %arg26[%c0_89, %c0_90] : memref<16x1xf32, #tpu.memory_space<vmem>>, vector<16x1xf32>
    %171 = vector.broadcast %170 : vector<16x1xf32> to vector<16x128xf32>
    %172 = arith.addf %169, %171 : vector<16x128xf32>
    %173 = arith.mulf %172, %172 : vector<16x128xf32>
    %cst_91 = arith.constant dense<0.000000e+00> : vector<128xf32>
    %174 = vector.multi_reduction <add>, %173, %cst_91 [0] : vector<16x128xf32> to vector<128xf32>
    %175 = vector.shape_cast %174 : vector<128xf32> to vector<1x128xf32>
    %cst_92 = arith.constant 1.600000e+01 : f32
    %176 = vector.broadcast %cst_92 : f32 to vector<1x128xf32>
    %177 = arith.divf %175, %176 : vector<1x128xf32>
    %cst_93 = arith.constant 9.99999993E-9 : f32
    %178 = vector.broadcast %cst_93 : f32 to vector<1x128xf32>
    %179 = arith.addf %177, %178 : vector<1x128xf32>
    %180 = math.rsqrt %179 : vector<1x128xf32>
    %181 = vector.broadcast %180 : vector<1x128xf32> to vector<16x128xf32>
    %182 = arith.mulf %172, %181 : vector<16x128xf32>
    %cst_94 = arith.constant 2.000000e-01 : f32
    %183 = vector.broadcast %cst_94 : f32 to vector<16x128xf32>
    %184 = arith.mulf %183, %182 : vector<16x128xf32>
    %185 = arith.maximumf %182, %184 : vector<16x128xf32>
    %c0_95 = arith.constant 0 : index
    %c0_96 = arith.constant 0 : index
    %186 = vector.load %arg27[%c0_95, %c0_96] : memref<48x16xbf16, #tpu.memory_space<vmem>>, vector<48x16xbf16>
    %187 = arith.truncf %185 : vector<16x128xf32> to vector<16x128xbf16>
    %cst_97 = arith.constant dense<0.000000e+00> : vector<48x128xf32>
    %188 = tpu.matmul %186, %187, %cst_97 {dimension_numbers = #tpu.dot_dimension_numbers<[1], [0], [0], [1], [0, 0, 1, 1], [], []>} : vector<48x16xbf16>, vector<16x128xbf16>, vector<48x128xf32> -> vector<48x128xf32>
    %189 = vector.extract_strided_slice %188 {offsets = [0, 0], sizes = [16, 128], strides = [1, 1]} : vector<48x128xf32> to vector<16x128xf32>
    %c1_i32_98 = arith.constant 1 : i32
    %190 = tpu.dynamic_rotate %189 by %c1_i32_98 dim 1 : vector<16x128xf32>, i32 -> vector<16x128xf32>
    %c0_99 = arith.constant 0 : index
    %c0_100 = arith.constant 0 : index
    %191 = vector.load %arg13[%c0_99, %c0_100] : memref<1x128xf32, #tpu.memory_space<vmem>>, vector<1x128xf32>
    %192 = vector.broadcast %191 : vector<1x128xf32> to vector<16x128xf32>
    %193 = arith.mulf %190, %192 : vector<16x128xf32>
    %194 = vector.extract_strided_slice %188 {offsets = [16, 0], sizes = [16, 128], strides = [1, 1]} : vector<48x128xf32> to vector<16x128xf32>
    %195 = arith.addf %193, %194 : vector<16x128xf32>
    %196 = vector.extract_strided_slice %188 {offsets = [32, 0], sizes = [16, 128], strides = [1, 1]} : vector<48x128xf32> to vector<16x128xf32>
    %c127_i32 = arith.constant 127 : i32
    %197 = tpu.dynamic_rotate %196 by %c127_i32 dim 1 : vector<16x128xf32>, i32 -> vector<16x128xf32>
    %c0_101 = arith.constant 0 : index
    %c0_102 = arith.constant 0 : index
    %198 = vector.load %arg14[%c0_101, %c0_102] : memref<1x128xf32, #tpu.memory_space<vmem>>, vector<1x128xf32>
    %199 = vector.broadcast %198 : vector<1x128xf32> to vector<16x128xf32>
    %200 = arith.mulf %197, %199 : vector<16x128xf32>
    %201 = arith.addf %195, %200 : vector<16x128xf32>
    %c0_103 = arith.constant 0 : index
    %c0_104 = arith.constant 0 : index
    %202 = vector.load %arg28[%c0_103, %c0_104] : memref<16x1xf32, #tpu.memory_space<vmem>>, vector<16x1xf32>
    %203 = vector.broadcast %202 : vector<16x1xf32> to vector<16x128xf32>
    %204 = arith.addf %201, %203 : vector<16x128xf32>
    %205 = arith.mulf %204, %204 : vector<16x128xf32>
    %cst_105 = arith.constant dense<0.000000e+00> : vector<128xf32>
    %206 = vector.multi_reduction <add>, %205, %cst_105 [0] : vector<16x128xf32> to vector<128xf32>
    %207 = vector.shape_cast %206 : vector<128xf32> to vector<1x128xf32>
    %cst_106 = arith.constant 1.600000e+01 : f32
    %208 = vector.broadcast %cst_106 : f32 to vector<1x128xf32>
    %209 = arith.divf %207, %208 : vector<1x128xf32>
    %cst_107 = arith.constant 9.99999993E-9 : f32
    %210 = vector.broadcast %cst_107 : f32 to vector<1x128xf32>
    %211 = arith.addf %209, %210 : vector<1x128xf32>
    %212 = math.rsqrt %211 : vector<1x128xf32>
    %213 = vector.broadcast %212 : vector<1x128xf32> to vector<16x128xf32>
    %214 = arith.mulf %204, %213 : vector<16x128xf32>
    %cst_108 = arith.constant 2.000000e-01 : f32
    %215 = vector.broadcast %cst_108 : f32 to vector<16x128xf32>
    %216 = arith.mulf %215, %214 : vector<16x128xf32>
    %217 = arith.maximumf %214, %216 : vector<16x128xf32>
    %c0_109 = arith.constant 0 : index
    %c0_110 = arith.constant 0 : index
    %218 = vector.load %arg31[%c0_109, %c0_110] : memref<1x16xbf16, #tpu.memory_space<vmem>>, vector<1x16xbf16>
    %219 = arith.truncf %217 : vector<16x128xf32> to vector<16x128xbf16>
    %cst_111 = arith.constant dense<0.000000e+00> : vector<1x128xf32>
    %220 = tpu.matmul %218, %219, %cst_111 {dimension_numbers = #tpu.dot_dimension_numbers<[1], [0], [0], [1], [0, 0, 1, 1], [], []>} : vector<1x16xbf16>, vector<16x128xbf16>, vector<1x128xf32> -> vector<1x128xf32>
    %c0_112 = arith.constant 0 : index
    %c0_113 = arith.constant 0 : index
    %221 = vector.load %arg32[%c0_112, %c0_113] : memref<1x1xf32, #tpu.memory_space<vmem>>, vector<1x1xf32>
    %222 = vector.broadcast %221 : vector<1x1xf32> to vector<1x128xf32>
    %223 = arith.addf %220, %222 : vector<1x128xf32>
    %c0_114 = arith.constant 0 : index
    %c0_115 = arith.constant 0 : index
    %224 = vector.load %arg29[%c0_114, %c0_115] : memref<1x16xbf16, #tpu.memory_space<vmem>>, vector<1x16xbf16>
    %225 = arith.truncf %143 : vector<16x64xf32> to vector<16x64xbf16>
    %cst_116 = arith.constant dense<0.000000e+00> : vector<1x64xf32>
    %226 = tpu.matmul %224, %225, %cst_116 {dimension_numbers = #tpu.dot_dimension_numbers<[1], [0], [0], [1], [0, 0, 1, 1], [], []>} : vector<1x16xbf16>, vector<16x64xbf16>, vector<1x64xf32> -> vector<1x64xf32>
    %c0_117 = arith.constant 0 : index
    %c0_118 = arith.constant 0 : index
    %227 = vector.load %arg30[%c0_117, %c0_118] : memref<1x1xf32, #tpu.memory_space<vmem>>, vector<1x1xf32>
    %228 = vector.broadcast %227 : vector<1x1xf32> to vector<1x64xf32>
    %229 = arith.addf %226, %228 : vector<1x64xf32>
    %230 = arith.truncf %229 : vector<1x64xf32> to vector<1x64xbf16>
    %c0_119 = arith.constant 0 : index
    %c0_120 = arith.constant 0 : index
    %231 = vector.load %arg17[%c0_119, %c0_120] : memref<64x128xbf16, #tpu.memory_space<vmem>>, vector<64x128xbf16>
    %cst_121 = arith.constant dense<0.000000e+00> : vector<1x128xf32>
    %232 = tpu.matmul %230, %231, %cst_121 {dimension_numbers = #tpu.dot_dimension_numbers<[1], [0], [0], [1], [0, 0, 1, 1], [], []>} : vector<1x64xbf16>, vector<64x128xbf16>, vector<1x128xf32> -> vector<1x128xf32>
    %c0_122 = arith.constant 0 : index
    %c0_123 = arith.constant 0 : index
    %233 = vector.load %arg18[%c0_122, %c0_123] : memref<64x128xbf16, #tpu.memory_space<vmem>>, vector<64x128xbf16>
    %cst_124 = arith.constant dense<0.000000e+00> : vector<1x128xf32>
    %234 = tpu.matmul %230, %233, %cst_124 {dimension_numbers = #tpu.dot_dimension_numbers<[1], [0], [0], [1], [0, 0, 1, 1], [], []>} : vector<1x64xbf16>, vector<64x128xbf16>, vector<1x128xf32> -> vector<1x128xf32>
    %235 = arith.addf %232, %234 : vector<1x128xf32>
    %c0_125 = arith.constant 0 : index
    %236 = memref.load %arg0[%c0_125] : memref<1xf32, #tpu.memory_space<smem>>
    %237 = vector.broadcast %236 : f32 to vector<1x128xf32>
    %238 = arith.mulf %237, %223 : vector<1x128xf32>
    %cst_126 = arith.constant 1.000000e+00 : f32
    %239 = arith.subf %cst_126, %236 : f32
    %240 = vector.broadcast %239 : f32 to vector<1x128xf32>
    %241 = arith.mulf %240, %235 : vector<1x128xf32>
    %242 = arith.addf %238, %241 : vector<1x128xf32>
    %c0_127 = arith.constant 0 : index
    %c0_128 = arith.constant 0 : index
    %243 = vector.load %arg33[%c0_127, %c0_128] : memref<1x128xf32, #tpu.memory_space<vmem>>, vector<1x128xf32>
    tpu.vector_store %arg33[%c0_127, %c0_128], %242 {strides = array<i32>} : memref<1x128xf32, #tpu.memory_space<vmem>>, vector<1x128xf32>,
    return
  }
}

</mosaic_0001>

<bundles_post_ra>
// kernel: generator_forward.1
= control target key start
LH: loop header
LB: loop body
LE: loop exit
PB: predicated region body
PF: predicated region fallthrough
CT: control target
= control target key end

     0   :  { %s3152_s3 = smov 1   ;;  %s3153_s7 = smov 2   ;;  %vm152_vm0 = vcmask 31744   ;;  %vm288_vm1 = vcmask 261120   ;;  %vm563_vm2 = vcmask 1041408   ;;  %vm1080_vm3 = vcmask 1047808   ;;  %s3824_s0 = inlined_call_operand.smem [shape: u32[34], index: -1, kind: input, shape index: {}] }
   0x1   :  { %s2539_s6 = sld [smem:[%s3824_s0 + %s3152_s3]]   ;;  %s3154_s11 = smov 3   ;;  %vm1235_vm4 = vcmask 515320   ;;  %vm3172_vm5 = vmmov 0   ;;  %vm1593_vm6 = vcmask 523264   ;;  %vm1635_vm7 = vcmask 130048  }
   0x2   :  { %s3206_s10 = sld [smem:[%s3824_s0 + %s3153_s7]]   ;;  %s3155_s15 = smov 5   ;;  %vm1702_vm8 = vcmask 1048064   ;;  %vm1785_vm9 = vcmask 1039864  }
   0x3   :  { %s2541_s14 = sld [smem:[%s3824_s0 + %s3154_s11]]   ;;  %s3157_s19 = smov 6  }
   0x4   :  { %s3266_s18 = sld [smem:[%s3824_s0 + %s3155_s15]]   ;;  %s3158_s23 = smov 4  }
   0x5   :  { %s2544_s22 = sld [smem:[%s3824_s0 + %s3157_s19]]   ;;  %s3159_s27 = smov 7  }
   0x6   :  { %s3275_s26 = sld [smem:[%s3824_s0 + %s3158_s23]]   ;;  %s3160_s1 = smov 32  }
   0x7   :  { %v144_v0 = vld [vmem:[%s2539_s6] sm:$0xff]  ;;  %v145_v1 = vld [vmem:[%s2539_s6 + $0x8] sm:$0xff]  ;;  %v146_v2 = vld [vmem:[%s2539_s6 + $0x10] sm:$0xff]  ;;  %s3384_s30 = sld [smem:[%s3824_s0 + %s3159_s27]]   ;;  %s3161_s2 = smov 10  }
   0x8   :  { %v147_v3 = vld [vmem:[%s2539_s6 + $0x18] sm:$0xff]  ;;  %v148_v4 = vmul.f32 %v144_v0, %v144_v0  ;;  %v149_v5 = vmul.f32 %v145_v1, %v145_v1  ;;  %v150_v6 = vmul.f32 %v146_v2, %v146_v2  ;;  %v3084_v8 = vld [vmem:[%s3206_s10] sm:$0xff]   ;;  %v3085_v31 = vld [vmem:[%s3206_s10 + $0x8] sm:$0xff]   ;;  %s2548_s6 = sld [smem:[%s3824_s0 + %s3161_s2]]   ;;  %s3162_s7 = smov 30  }
   0x9   :  { %v151_v7 = vmul.f32 %v147_v3, %v147_v3  ;;  %2817 = vmatprep.mubr.msk.bf16.mxu0 %vm288_vm1, %v3084_v8  ;;  %v3086_v32 = vld [vmem:[%s3206_s10 + $0x10] sm:$0xff]   ;;  %v3087_v33 = vld [vmem:[%s3206_s10 + $0x18] sm:$0xff]   ;;  %v3088_v34 = vld [vmem:[%s3206_s10 + $0x20] sm:$0xff]   ;;  %s3163_s11 = smov 8   ;;  %s3164_s15 = smov 9  }
   0xa   :  { %v153_v9 = vsel %vm152_vm0, %v148_v4, 0.0  ;;  %v154_v10 = vsel %vm152_vm0, %v149_v5, 0.0  ;;  %v156_v11 = vsel %vm152_vm0, %v150_v6, 0.0  ;;  %v3089_v35 = vld [vmem:[%s3206_s10 + $0x28] sm:$0xff]   ;;  %v3090_v36 = vld [vmem:[%s3206_s10 + $0x30] sm:$0xff]   ;;  %v3091_v37 = vld [vmem:[%s3206_s10 + $0x38] sm:$0xff]  }
   0xb   :  { %v155_v12 = vadd.f32 %v154_v10, %v153_v9  ;;  %v158_v13 = vsel %vm152_vm0, %v151_v7, 0.0  ;;  %v3092_v38 = vld [vmem:[%s3206_s10 + $0x40] sm:$0xff]   ;;  %v3093_v39 = vld [vmem:[%s3206_s10 + $0x48] sm:$0xff]   ;;  %v3094_v40 = vld [vmem:[%s3206_s10 + $0x50] sm:$0xff]   ;;  %s3165_s19 = smov 31   ;;  %s3166_s20 = smov 19  }
   0xc   :  { %v3095_v41 = vld [vmem:[%s3206_s10 + $0x58] sm:$0xff]   ;;  %v3096_v42 = vld [vmem:[%s3206_s10 + $0x60] sm:$0xff]   ;;  %v3097_v43 = vld [vmem:[%s3206_s10 + $0x68] sm:$0xff]   ;;  %s2557_s23 = sld [smem:[%s3824_s0 + %s3166_s20]]   ;;  %s3167_s24 = smov 20  }
   0xd   :  { %v157_v14 = vadd.f32 %v156_v11, %v155_v12  ;;  %v3098_v44 = vld [vmem:[%s3206_s10 + $0x70] sm:$0xff]   ;;  %v3099_v45 = vld [vmem:[%s3206_s10 + $0x78] sm:$0xff]   ;;  %v514_v46 = vld [vmem:[%s2541_s14] sm:$0x3]  ;;  %s2568_s10 = sld [smem:[%s3824_s0 + %s3162_s7]]   ;;  %s3168_s28 = smov 97  }
   0xe   :  { %3039 = vmatprep.subr.msk.bf16.mxu1 %vm563_vm2, %v514_v46  ;;  %v565_v47 = vsel %vm563_vm2, %v514_v46, 0  ;;  %s3454_s14 = sld [smem:[%s3824_s0 + %s3163_s11]]   ;;  %s3170_s29 = smov 16  }
   0xf   :  { %v159_v15 = vadd.f32 %v158_v13, %v157_v14  ;;  %2850 = vmatpush3.bf16.msra.mxu1 %v565_v47  ;;  %s2558_s27 = sld [smem:[%s3824_s0 + %s3167_s24]]   ;;  %s3171_s5 = smov 15  }
  0x10   :  { %s2554_s4 = sld [smem:[%s3824_s0 + %s3170_s29]]   ;;  %s3173_s9 = smov 21  }
  0x11   :  { %v160_v16 = vrot.slane %v159_v15, 4  ;;  %s2553_s8 = sld [smem:[%s3824_s0 + %s3171_s5]]   ;;  %s3174_s13 = smov 127  }
  0x12   :  { %s2559_s12 = sld [smem:[%s3824_s0 + %s3173_s9]]   ;;  %s3177_s20 = smov 12  }
  0x13   :  { %v161_v17 = vadd.f32 %v160_v16, %v159_v15  ;;  %s3178_s24 = smov 23   ;;  %s3181_s5 = smov 62  }
  0x14   :  { %s3185_s16 = smov 18   ;;  %s3188_s29 = smov 28  }
  0x15   :  { %v162_v18 = vrot.slane %v161_v17, 2  ;;  %s2556_s21 = sld [smem:[%s3824_s0 + %s3185_s16]]  }
  0x16   :  { %s2570_s11 = sld [smem:[%s3824_s0 + %s3160_s1]]  }
  0x17   :  { %v163_v19 = vadd.f32 %v162_v18, %v161_v17 }
  0x19   :  { %v164_v20 = vrot.slane %v163_v19, 1 }
  0x1b   :  { %v165_v21 = vadd.f32 %v164_v20, %v163_v19 }
  0x1d   :  { %v167_v22 = vmul.f32 0.03125, %v165_v21 }
  0x1f   :  { %v168_v23 = vadd.f32 1e-08, %v167_v22 }
  0x21   :  { %3138 = vrsqrt.f32 %v168_v23 }
  0x2b   :  { %v3139_v24 = vpop.eup %3138 }
  0x2c   :  { %v170_v25 = vmul.f32 %v3139_v24, %v144_v0  ;;  %v171_v26 = vmul.f32 %v3139_v24, %v145_v1  ;;  %v172_v27 = vmul.f32 %v3139_v24, %v146_v2  ;;  %v173_v28 = vmul.f32 %v3139_v24, %v147_v3 }
  0x2e   :  { %v206_v29 = vpack.c.bf16 %v171_v26, %v170_v25  ;;  %v207_v30 = vpack.c.bf16 %v173_v28, %v172_v27 }
  0x30   :  { %2813 = vmatprep.subr.bf16.mxu0 %v206_v29 }
  0x31   :  { %2814 = vmatpush3.bf16.msra.mxu0 %v206_v29 }
  0x32   :  { %2815 = vmatprep.subr.bf16.mxu0 %v207_v30 }
  0x35   :  { %2816 = vmatpush3.bf16.msra.mxu0 %v207_v30 }
  0x38   :  { %2818 = vmatmul.mubr.msk.bf16.vlgmr.msra.gmra.mrb[0].mxu0 %vm288_vm1, %v3085_v31 }
  0x39   :  { %2821 = vmatprep.mubr.msk.bf16.mxu0 %vm288_vm1, %v3086_v32  ;;  %v3102_v32 = vld [vmem:[%s3266_s18 + $0x4] ss:$8 sps:$4 sm:$0xff]  }
  0x40   :  { %2822 = vmatmul.mubr.msk.bf16.gmra.mrb[4].mxu0 %vm288_vm1, %v3087_v33  ;;  %v3156_v33 = vmov 0  }
  0x41   :  { %2825 = vmatprep.mubr.msk.bf16.mxu0 %vm288_vm1, %v3088_v34  ;;  %3082 = vset.pattern.permute.xlu0 %v3156_v33  ;;  %v812_v34 = vld [vmem:[%s2544_s22] sm:$0xff] }
  0x42   :  { %3083 = vset.pattern.permute.xlu1 %v3156_v33  ;;  %818 = vperm.xlu0 %3082, %v812_v34   ;;  %v744_v34 = vld [vmem:[%s3275_s26 + $0x80] sm:$0xff] }
  0x48   :  { %2826 = vmatmul.mubr.msk.bf16.gmra.mrb[8].mxu0 %vm288_vm1, %v3089_v35  ;;  %v814_v35 = vld [vmem:[%s2544_s22 + $0x10] sm:$0xff] }
  0x49   :  { %2829 = vmatprep.mubr.msk.bf16.mxu0 %vm288_vm1, %v3090_v36  ;;  %828 = vperm.xlu1 %3083, %v814_v35   ;;  %v813_v36 = vld [vmem:[%s2544_s22 + $0x8] sm:$0xff] }
  0x4a   :  { %823 = vperm.xlu0 %3082, %v813_v36   ;;  %v745_v35 = vld [vmem:[%s3275_s26 + $0x88] sm:$0xff] }
  0x50   :  { %2830 = vmatmul.mubr.msk.bf16.gmra.mrb[12].mxu0 %vm288_vm1, %v3091_v37  ;;  %v815_v37 = vld [vmem:[%s2544_s22 + $0x18] sm:$0xff]  ;;  %s3186_s22 = smov 17  }
  0x51   :  { %2833 = vmatprep.mubr.msk.bf16.mxu0 %vm288_vm1, %v3092_v38  ;;  %833 = vperm.xlu1 %3083, %v815_v37   ;;  %s2555_s25 = sld [smem:[%s3824_s0 + %s3186_s22]]  }
  0x52   :  { %s2569_s22 = sld [smem:[%s3824_s0 + %s3165_s19]]  }
  0x58   :  { %2834 = vmatmul.mubr.msk.bf16.gmra.mrb[16].mxu0 %vm288_vm1, %v3093_v39  ;;  %v730_v39 = vld [vmem:[%s3275_s26 + $0x10] sm:$0xff] }
  0x59   :  { %2837 = vmatprep.mubr.msk.bf16.mxu0 %vm288_vm1, %v3094_v40  ;;  %v731_v40 = vld [vmem:[%s3275_s26 + $0x18] sm:$0xff] }
  0x60   :  { %2838 = vmatmul.mubr.msk.bf16.gmra.mrb[20].mxu0 %vm288_vm1, %v3095_v41 }
  0x61   :  { %2841 = vmatprep.mubr.msk.bf16.mxu0 %vm288_vm1, %v3096_v42  ;;  %v728_v42 = vld [vmem:[%s3275_s26] sm:$0xff] }
  0x68   :  { %2842 = vmatmul.mubr.msk.bf16.gmra.mrb[24].mxu0 %vm288_vm1, %v3097_v43  ;;  %v729_v43 = vld [vmem:[%s3275_s26 + $0x8] sm:$0xff] }
  0x69   :  { %2845 = vmatprep.mubr.msk.bf16.mxu0 %vm288_vm1, %v3098_v44 }
  0x70   :  { %2846 = vmatmul.mubr.msk.bf16.gmra.mrb[28].mxu0 %vm288_vm1, %v3099_v45 }
 0x10b   :  { %v2819_v48 = vpop.f32.mrb[0].mxu0 }
 0x10c   :  { %v371_v49 = vpop.f32.mrb[1].mxu0 }
 0x10d   :  { %v2820_v50 = vpop.f32.mrb[2].mxu0 }
 0x10e   :  { %v499_v51 = vpack.c.bf16 %v2820_v50, %v2819_v48  ;;  %v374_v52 = vpop.f32.mrb[3].mxu0 }
 0x10f   :  { %v498_v53 = vpack.c.bf16 %v374_v52, %v371_v49 }
 0x111   :  { %2851 = vmatprep.mubr.msk.bf16.mxu1 %vm152_vm0, %v498_v53  ;;  %v734_v53 = vld [vmem:[%s3275_s26 + $0x30] sm:$0xff] }
 0x112   :  { %2852 = vmatmul.mubr.msk.bf16.vlgmr.msra.gmra.mrb[0].mxu1 %vm152_vm0, %v499_v51 }
 0x113   :  { %v2823_v54 = vpop.f32.mrb[4].mxu0 }
 0x114   :  { %v387_v55 = vpop.f32.mrb[5].mxu0 }
 0x115   :  { %v2824_v56 = vpop.f32.mrb[6].mxu0 }
 0x116   :  { %v501_v57 = vpack.c.bf16 %v2824_v56, %v2823_v54  ;;  %v390_v58 = vpop.f32.mrb[7].mxu0  ;;  %v735_v54 = vld [vmem:[%s3275_s26 + $0x38] sm:$0xff]  ;;  %v732_v56 = vld [vmem:[%s3275_s26 + $0x20] sm:$0xff] }
 0x117   :  { %v500_v59 = vpack.c.bf16 %v390_v58, %v387_v55 }
 0x119   :  { %2855 = vmatprep.mubr.msk.bf16.mxu1 %vm152_vm0, %v500_v59 }
 0x11a   :  { %2856 = vmatmul.mubr.msk.bf16.gmra.mrb[4].mxu1 %vm152_vm0, %v501_v57  ;;  %v733_v57 = vld [vmem:[%s3275_s26 + $0x28] sm:$0xff] }
 0x11b   :  { %v2827_v60 = vpop.f32.mrb[8].mxu0 }
 0x11c   :  { %v403_v61 = vpop.f32.mrb[9].mxu0 }
 0x11d   :  { %v2828_v62 = vpop.f32.mrb[10].mxu0 }
 0x11e   :  { %v503_v63 = vpack.c.bf16 %v2828_v62, %v2827_v60  ;;  %v406_v0 = vpop.f32.mrb[11].mxu0 }
 0x11f   :  { %v502_v1 = vpack.c.bf16 %v406_v0, %v403_v61 }
 0x121   :  { %2859 = vmatprep.mubr.msk.bf16.mxu1 %vm152_vm0, %v502_v1 }
 0x122   :  { %2860 = vmatmul.mubr.msk.bf16.gmra.mrb[8].mxu1 %vm152_vm0, %v503_v63 }
 0x123   :  { %v2831_v2 = vpop.f32.mrb[12].mxu0 }
 0x124   :  { %v419_v3 = vpop.f32.mrb[13].mxu0 }
 0x125   :  { %v2832_v4 = vpop.f32.mrb[14].mxu0 }
 0x126   :  { %v505_v5 = vpack.c.bf16 %v2832_v4, %v2831_v2  ;;  %v422_v6 = vpop.f32.mrb[15].mxu0  ;;  %v739_v4 = vld [vmem:[%s3275_s26 + $0x58] sm:$0xff] }
 0x127   :  { %v504_v7 = vpack.c.bf16 %v422_v6, %v419_v3  ;;  %v738_v3 = vld [vmem:[%s3275_s26 + $0x50] sm:$0xff]  ;;  %v736_v6 = vld [vmem:[%s3275_s26 + $0x40] sm:$0xff] }
 0x129   :  { %2863 = vmatprep.mubr.msk.bf16.mxu1 %vm152_vm0, %v504_v7  ;;  %v737_v7 = vld [vmem:[%s3275_s26 + $0x48] sm:$0xff] }
 0x12a   :  { %2864 = vmatmul.mubr.msk.bf16.gmra.mrb[12].mxu1 %vm152_vm0, %v505_v5 }
 0x12b   :  { %v2835_v8 = vpop.f32.mrb[16].mxu0 }
 0x12c   :  { %v435_v9 = vpop.f32.mrb[17].mxu0 }
 0x12d   :  { %v2836_v10 = vpop.f32.mrb[18].mxu0 }
 0x12e   :  { %v507_v11 = vpack.c.bf16 %v2836_v10, %v2835_v8  ;;  %v438_v12 = vpop.f32.mrb[19].mxu0 }
 0x12f   :  { %v506_v13 = vpack.c.bf16 %v438_v12, %v435_v9 }
 0x131   :  { %2867 = vmatprep.mubr.msk.bf16.mxu1 %vm152_vm0, %v506_v13 }
 0x132   :  { %2868 = vmatmul.mubr.msk.bf16.gmra.mrb[16].mxu1 %vm152_vm0, %v507_v11 }
 0x133   :  { %v2839_v14 = vpop.f32.mrb[20].mxu0 }
 0x134   :  { %v451_v15 = vpop.f32.mrb[21].mxu0 }
 0x135   :  { %v2840_v16 = vpop.f32.mrb[22].mxu0 }
 0x136   :  { %v509_v17 = vpack.c.bf16 %v2840_v16, %v2839_v14  ;;  %v454_v18 = vpop.f32.mrb[23].mxu0 }
 0x137   :  { %v508_v19 = vpack.c.bf16 %v454_v18, %v451_v15  ;;  %v743_v18 = vld [vmem:[%s3275_s26 + $0x78] sm:$0xff] }
 0x139   :  { %2871 = vmatprep.mubr.msk.bf16.mxu1 %vm152_vm0, %v508_v19 }
 0x13a   :  { %2872 = vmatmul.mubr.msk.bf16.gmra.mrb[20].mxu1 %vm152_vm0, %v509_v17  ;;  %v742_v17 = vld [vmem:[%s3275_s26 + $0x70] sm:$0xff] }
 0x13b   :  { %v2843_v20 = vpop.f32.mrb[24].mxu0 }
 0x13c   :  { %v467_v21 = vpop.f32.mrb[25].mxu0 }
 0x13d   :  { %v2844_v22 = vpop.f32.mrb[26].mxu0 }
 0x13e   :  { %v511_v23 = vpack.c.bf16 %v2844_v22, %v2843_v20  ;;  %v470_v24 = vpop.f32.mrb[27].mxu0  ;;  %v740_v20 = vld [vmem:[%s3275_s26 + $0x60] sm:$0xff] }
 0x13f   :  { %v510_v25 = vpack.c.bf16 %v470_v24, %v467_v21  ;;  %v741_v21 = vld [vmem:[%s3275_s26 + $0x68] sm:$0xff] }
 0x141   :  { %2875 = vmatprep.mubr.msk.bf16.mxu1 %vm152_vm0, %v510_v25 }
 0x142   :  { %2876 = vmatmul.mubr.msk.bf16.gmra.mrb[24].mxu1 %vm152_vm0, %v511_v23 }
 0x143   :  { %v2847_v26 = vpop.f32.mrb[28].mxu0 }
 0x144   :  { %v483_v27 = vpop.f32.mrb[29].mxu0 }
 0x145   :  { %v2848_v28 = vpop.f32.mrb[30].mxu0 }
 0x146   :  { %v513_v29 = vpack.c.bf16 %v2848_v28, %v2847_v26  ;;  %v486_v30 = vpop.f32.mrb[31].mxu0 }
 0x147   :  { %v512_v31 = vpack.c.bf16 %v486_v30, %v483_v27 }
 0x149   :  { %2879 = vmatprep.mubr.msk.bf16.mxu1 %vm152_vm0, %v512_v31  ;;  %v746_v31 = vld [vmem:[%s3275_s26 + $0x90] sm:$0xff] }
 0x14a   :  { %2880 = vmatmul.mubr.msk.bf16.gmra.mrb[28].mxu1 %vm152_vm0, %v513_v29 }
 0x14b   :  { %888 = vmatprep.mubr.bf16.mxu1 %v3102_v32  ;;  %v747_v32 = vld [vmem:[%s3275_s26 + $0x98] sm:$0xff] }
 0x1e5   :  { %v2853_v38 = vpop.f32.mrb[0].mxu1 }
 0x1e6   :  { %v601_v41 = vpop.f32.mrb[1].mxu1  ;;  %v3281_v45 = vmul.f32 %v2853_v38, %v730_v39 }
 0x1e7   :  { %v2854_v44 = vpop.f32.mrb[2].mxu1  ;;  %v3285_v48 = vmul.f32 %v728_v42, %v601_v41 }
 0x1e8   :  { %v3283_v46 = vmul.f32 %v2854_v44, %v731_v40  ;;  %v604_v47 = vpop.f32.mrb[3].mxu1 }
 0x1e9   :  { %v3287_v49 = vmul.f32 %v729_v43, %v604_v47  ;;  %v750_v47 = vld [vmem:[%s3275_s26 + $0xb0] sm:$0xff] }
 0x1ea   :  { %v797_v50 = vpack.c.bf16 %v3283_v46, %v3281_v45 }
 0x1eb   :  { %v796_v51 = vpack.c.bf16 %v3287_v49, %v3285_v48  ;;  %v751_v48 = vld [vmem:[%s3275_s26 + $0xb8] sm:$0xff] }
 0x1ed   :  { %v2857_v52 = vpop.f32.mrb[4].mxu1 }
 0x1ee   :  { %v617_v55 = vpop.f32.mrb[5].mxu1  ;;  %v3297_v59 = vmul.f32 %v2857_v52, %v734_v53  ;;  %v748_v52 = vld [vmem:[%s3275_s26 + $0xa0] sm:$0xff]  ;;  %v749_v53 = vld [vmem:[%s3275_s26 + $0xa8] sm:$0xff] }
 0x1ef   :  { %v2858_v58 = vpop.f32.mrb[6].mxu1  ;;  %v3301_v62 = vmul.f32 %v732_v56, %v617_v55 }
 0x1f0   :  { %v3299_v60 = vmul.f32 %v2858_v58, %v735_v54  ;;  %v620_v61 = vpop.f32.mrb[7].mxu1 }
 0x1f1   :  { %v3303_v63 = vmul.f32 %v733_v57, %v620_v61 }
 0x1f2   :  { %v799_v0 = vpack.c.bf16 %v3299_v60, %v3297_v59 }
 0x1f3   :  { %v798_v1 = vpack.c.bf16 %v3303_v63, %v3301_v62  ;;  %v758_v62 = vld [vmem:[%s3275_s26 + $0xf0] sm:$0xff]  ;;  %v759_v63 = vld [vmem:[%s3275_s26 + $0xf8] sm:$0xff] }
 0x1f5   :  { %v2861_v2 = vpop.f32.mrb[8].mxu1 }
 0x1f6   :  { %v633_v5 = vpop.f32.mrb[9].mxu1  ;;  %v3313_v9 = vmul.f32 %v2861_v2, %v738_v3 }
 0x1f7   :  { %v2862_v8 = vpop.f32.mrb[10].mxu1  ;;  %v3317_v12 = vmul.f32 %v736_v6, %v633_v5  ;;  %v754_v5 = vld [vmem:[%s3275_s26 + $0xd0] sm:$0xff] }
 0x1f8   :  { %v3315_v10 = vmul.f32 %v2862_v8, %v739_v4  ;;  %v636_v11 = vpop.f32.mrb[11].mxu1  ;;  %v753_v8 = vld [vmem:[%s3275_s26 + $0xc8] sm:$0xff] }
 0x1f9   :  { %v3319_v13 = vmul.f32 %v737_v7, %v636_v11  ;;  %v752_v7 = vld [vmem:[%s3275_s26 + $0xc0] sm:$0xff] }
 0x1fa   :  { %v801_v14 = vpack.c.bf16 %v3315_v10, %v3313_v9  ;;  %v3106_v9 = vld [vmem:[%s3384_s30 + $0x10] sm:$0xff]   ;;  %v3110_v10 = vld [vmem:[%s3384_s30] sm:$0xff]  }
 0x1fb   :  { %v800_v15 = vpack.c.bf16 %v3319_v13, %v3317_v12  ;;  %v3100_v12 = vld [vmem:[%s3266_s18] ss:$8 sps:$4 sm:$0xff]   ;;  %v3103_v13 = vld [vmem:[%s3266_s18 + $0x14] ss:$8 sps:$4 sm:$0xff]   ;;  %2887 = vmatprep.mubr.msk.bf16.mxu0 %vm288_vm1, %v3110_v10 }
 0x1fd   :  { %v2865_v16 = vpop.f32.mrb[12].mxu1 }
 0x1fe   :  { %v649_v19 = vpop.f32.mrb[13].mxu1  ;;  %v3329_v23 = vmul.f32 %v2865_v16, %v742_v17 }
 0x1ff   :  { %v2866_v22 = vpop.f32.mrb[14].mxu1  ;;  %v3333_v26 = vmul.f32 %v740_v20, %v649_v19 }
 0x200   :  { %v3331_v24 = vmul.f32 %v2866_v22, %v743_v18  ;;  %v652_v25 = vpop.f32.mrb[15].mxu1  ;;  %v757_v22 = vld [vmem:[%s3275_s26 + $0xe8] sm:$0xff] }
 0x201   :  { %v3335_v27 = vmul.f32 %v741_v21, %v652_v25  ;;  %v756_v21 = vld [vmem:[%s3275_s26 + $0xe0] sm:$0xff] }
 0x202   :  { %v803_v28 = vpack.c.bf16 %v3331_v24, %v3329_v23 }
 0x203   :  { %v802_v29 = vpack.c.bf16 %v3335_v27, %v3333_v26 }
 0x205   :  { %v2869_v30 = vpop.f32.mrb[16].mxu1 }
 0x206   :  { %v665_v33 = vpop.f32.mrb[17].mxu1  ;;  %v778_v37 = vmul.f32 %v2869_v30, %v746_v31 }
 0x207   :  { %v2870_v36 = vpop.f32.mrb[18].mxu1  ;;  %v776_v40 = vmul.f32 %v744_v34, %v665_v33 }
 0x208   :  { %v779_v38 = vmul.f32 %v2870_v36, %v747_v32  ;;  %v668_v39 = vpop.f32.mrb[19].mxu1 }
 0x209   :  { %v777_v41 = vmul.f32 %v745_v35, %v668_v39 }
 0x20a   :  { %v805_v42 = vpack.c.bf16 %v779_v38, %v778_v37  ;;  %v829_v38 = vpop.permute.xlu1 %828 }
 0x20b   :  { %v804_v43 = vpack.c.bf16 %v777_v41, %v776_v40 }
 0x20d   :  { %v2873_v44 = vpop.f32.mrb[20].mxu1  ;;  %2725 = vmatprep.subr.bf16.mxu1 %v804_v43 }
 0x20e   :  { %v681_v49 = vpop.f32.mrb[21].mxu1  ;;  %2726 = vmatpush3.bf16.msra.mxu1 %v796_v51  ;;  %v782_v55 = vmul.f32 %v2873_v44, %v750_v47  ;;  %v755_v51 = vld [vmem:[%s3275_s26 + $0xd8] sm:$0xff] }
 0x20f   :  { %v2874_v54 = vpop.f32.mrb[22].mxu1  ;;  %2727 = vmatprep.subr.bf16.mxu1 %v805_v42  ;;  %v780_v58 = vmul.f32 %v748_v52, %v681_v49 }
 0x210   :  { %v783_v56 = vmul.f32 %v2874_v54, %v751_v48  ;;  %v684_v57 = vpop.f32.mrb[23].mxu1 }
 0x211   :  { %v781_v61 = vmul.f32 %v749_v53, %v684_v57 }
 0x212   :  { %v807_v2 = vpack.c.bf16 %v783_v56, %v782_v55  ;;  %2728 = vmatpush3.bf16.msra.mxu1 %v797_v50  ;;  %v834_v55 = vpop.permute.xlu1 %833 }
 0x213   :  { %v806_v3 = vpack.c.bf16 %v781_v61, %v780_v58 }
 0x215   :  { %v2877_v4 = vpop.f32.mrb[24].mxu1  ;;  %2729 = vmatprep.subr.bf16.mxu1 %v806_v3 }
 0x216   :  { %v697_v6 = vpop.f32.mrb[25].mxu1  ;;  %2730 = vmatpush3.bf16.msra.mxu1 %v798_v1  ;;  %v786_v45 = vmul.f32 %v2877_v4, %v754_v5 }
 0x217   :  { %v2878_v11 = vpop.f32.mrb[26].mxu1  ;;  %2731 = vmatprep.subr.bf16.mxu1 %v807_v2  ;;  %v784_v16 = vmul.f32 %v752_v7, %v697_v6 }
 0x218   :  { %v787_v46 = vmul.f32 %v2878_v11, %v755_v51  ;;  %v700_v50 = vpop.f32.mrb[27].mxu1 }
 0x219   :  { %v785_v17 = vmul.f32 %v753_v8, %v700_v50 }
 0x21a   :  { %v809_v18 = vpack.c.bf16 %v787_v46, %v786_v45  ;;  %2732 = vmatpush3.bf16.msra.mxu1 %v799_v0 }
 0x21b   :  { %v808_v19 = vpack.c.bf16 %v785_v17, %v784_v16 }
 0x21d   :  { %v2881_v20 = vpop.f32.mrb[28].mxu1  ;;  %2733 = vmatprep.subr.bf16.mxu1 %v808_v19 }
 0x21e   :  { %v713_v1 = vpop.f32.mrb[29].mxu1  ;;  %2734 = vmatpush3.bf16.msra.mxu1 %v800_v15  ;;  %v790_v30 = vmul.f32 %v2881_v20, %v758_v62  ;;  %v3105_v15 = vld [vmem:[%s3266_s18 + $0x10] ss:$8 sps:$4 sm:$0xff]   ;;  %s2547_s18 = sld [smem:[%s3824_s0 + %s3164_s15]]   ;;  %s3184_s15 = smov 65  }
 0x21f   :  { %v2882_v25 = vpop.f32.mrb[30].mxu1  ;;  %2735 = vmatprep.subr.bf16.mxu1 %v809_v18  ;;  %v788_v0 = vmul.f32 %v756_v21, %v713_v1 }
 0x220   :  { %v791_v59 = vmul.f32 %v2882_v25, %v759_v63  ;;  %v716_v60 = vpop.f32.mrb[31].mxu1 }
 0x221   :  { %v789_v31 = vmul.f32 %v757_v22, %v716_v60  ;;  %v3107_v60 = vld [vmem:[%s3384_s30 + $0x18] sm:$0xff]  }
 0x222   :  { %v811_v32 = vpack.c.bf16 %v791_v59, %v790_v30  ;;  %2736 = vmatpush3.bf16.msra.mxu1 %v801_v14  ;;  %v819_v14 = vpop.permute.xlu0 %818 }
 0x223   :  { %v810_v33 = vpack.c.bf16 %v789_v31, %v788_v0  ;;  %v3111_v0 = vld [vmem:[%s3384_s30 + $0x8] sm:$0xff]   ;;  %v3108_v31 = vld [vmem:[%s3384_s30 + $0x20] sm:$0xff]  }
 0x225   :  { %2737 = vmatprep.subr.bf16.mxu1 %v810_v33 }
 0x226   :  { %2738 = vmatpush3.bf16.msra.mxu1 %v802_v29  ;;  %v824_v29 = vpop.permute.xlu0 %823 }
 0x227   :  { %2739 = vmatprep.subr.bf16.mxu1 %v811_v32  ;;  %v3109_v32 = vld [vmem:[%s3384_s30 + $0x28] sm:$0xff]  }
 0x22a   :  { %2740 = vmatpush3.bf16.msra.mxu1 %v803_v28 }
 0x22d   :  { %889 = vmatmul.mubr.bf16.vlgmr.msra.gmra.mrb[32].mxu1 %v3100_v12 }
 0x22e   :  { %896 = vmatprep.mubr.bf16.mxu1 %v3103_v13 }
 0x235   :  { %897 = vmatmul.mubr.bf16.gmra.mrb[36].mxu1 %v3105_v15 }
 0x236   :  { %2891 = vmatprep.mubr.msk.bf16.mxu1 %vm288_vm1, %v3106_v9 }
 0x300   :  { %v2741_v23 = vpop.f32.mrb[32].mxu1 }
 0x301   :  { %v2742_v24 = vpop.f32.mrb[33].mxu1 }
 0x302   :  { %v2743_v26 = vadd.f32 %v2742_v24, %v2741_v23  ;;  %v2744_v27 = vpop.f32.mrb[34].mxu1 }
 0x303   :  { %v2745_v28 = vpop.f32.mrb[35].mxu1 }
 0x304   :  { %v891_v34 = vadd.f32 %v2743_v26, %v819_v14  ;;  %v2746_v35 = vadd.f32 %v2745_v28, %v2744_v27 }
 0x306   :  { %v905_v36 = vmul.f32 0.2, %v891_v34  ;;  %v894_v37 = vadd.f32 %v2746_v35, %v824_v29  ;;  %v2637_v29 = vld [vmem:[%s2548_s6] ss:$0 sm:$0xff]  ;;  %s3182_s6 = smov 24  }
 0x307   :  { %s2562_s9 = sld [smem:[%s3824_s0 + %s3182_s6]]  }
 0x308   :  { %v909_v39 = vmax.f32 %v891_v34, %v905_v36  ;;  %v2747_v40 = vpop.f32.mrb[36].mxu1  ;;  %v906_v41 = vmul.f32 0.2, %v894_v37  ;;  %v73_v34 = vstv %s2568_s10  ;;  %s3183_s10 = smov 25  }
 0x309   :  { %v2748_v42 = vpop.f32.mrb[37].mxu1  ;;  %74 = vst [vmem:[#allocation3] sm:$0x1] %v73_v34 }
 0x30a   :  { %v913_v43 = vmul.f32 %v909_v39, %v909_v39  ;;  %v910_v44 = vmax.f32 %v894_v37, %v906_v41  ;;  %v2749_v47 = vadd.f32 %v2748_v42, %v2747_v40  ;;  %v2750_v48 = vpop.f32.mrb[38].mxu1 }
 0x30b   :  { %v2751_v49 = vpop.f32.mrb[39].mxu1 }
 0x30c   :  { %v914_v52 = vmul.f32 %v910_v44, %v910_v44  ;;  %v899_v53 = vadd.f32 %v2749_v47, %v829_v38  ;;  %v2752_v54 = vadd.f32 %v2751_v49, %v2750_v48  ;;  %v917_v56 = vsel %vm288_vm1, %v913_v43, 0.0  ;;  %v1195_v49 = vld [vmem:[%s3454_s14] sm:$0xff] }
 0x30e   :  { %v918_v57 = vsel %vm288_vm1, %v914_v52, 0.0  ;;  %v907_v58 = vmul.f32 0.2, %v899_v53  ;;  %v902_v61 = vadd.f32 %v2752_v54, %v834_v55  ;;  %v1196_v52 = vld [vmem:[%s3454_s14 + $0x8] sm:$0xff] }
 0x30f   :  { %v919_v2 = vadd.f32 %v918_v57, %v917_v56  ;;  %v1197_v56 = vld [vmem:[%s3454_s14 + $0x10] sm:$0xff] }
 0x310   :  { %v911_v3 = vmax.f32 %v899_v53, %v907_v58  ;;  %v908_v4 = vmul.f32 0.2, %v902_v61  ;;  %v2636_v53 = vld [vmem:[%s2547_s18] ss:$0 sm:$0xff]  ;;  %s3176_s18 = smov 64  }
 0x312   :  { %v915_v5 = vmul.f32 %v911_v3, %v911_v3  ;;  %v912_v51 = vmax.f32 %v902_v61, %v908_v4  ;;  %v1198_v61 = vld [vmem:[%s3454_s14 + $0x18] sm:$0xff]  ;;  %s3175_s14 = smov 22  }
 0x313   :  { %s3589_s17 = sld [smem:[%s3824_s0 + %s3175_s14]]  }
 0x314   :  { %v920_v6 = vsel %vm288_vm1, %v915_v5, 0.0  ;;  %v916_v7 = vmul.f32 %v912_v51, %v912_v51  ;;  %s2563_s14 = sld [smem:[%s3824_s0 + %s3183_s10]]  }
 0x315   :  { %v921_v8 = vadd.f32 %v920_v6, %v919_v2 }
 0x316   :  { %v922_v11 = vsel %vm288_vm1, %v916_v7, 0.0 }
 0x317   :  { %v923_v45 = vadd.f32 %v922_v11, %v921_v8 }
 0x319   :  { %v924_v46 = vrot.slane %v923_v45, 4 }
 0x31b   :  { %v925_v50 = vadd.f32 %v924_v46, %v923_v45 }
 0x31d   :  { %v926_v16 = vrot.slane %v925_v50, 2 }
 0x31f   :  { %v927_v17 = vadd.f32 %v926_v16, %v925_v50 }
 0x321   :  { %v928_v18 = vrot.slane %v927_v17, 1 }
 0x323   :  { %v929_v19 = vadd.f32 %v928_v18, %v927_v17 }
 0x325   :  { %v930_v20 = vmul.f32 0.03125, %v929_v19 }
 0x327   :  { %v931_v62 = vadd.f32 1e-08, %v930_v20 }
 0x329   :  { %3140 = vrsqrt.f32 %v931_v62 }
 0x333   :  { %v3141_v63 = vpop.eup %3140 }
 0x334   :  { %v935_v1 = vmul.f32 %v3141_v63, %v911_v3  ;;  %v936_v21 = vmul.f32 %v3141_v63, %v912_v51  ;;  %v933_v22 = vmul.f32 %v3141_v63, %v909_v39  ;;  %v934_v25 = vmul.f32 %v3141_v63, %v910_v44 }
 0x336   :  { %v950_v30 = vpack.c.bf16 %v936_v21, %v935_v1  ;;  %v949_v59 = vpack.c.bf16 %v934_v25, %v933_v22 }
 0x338   :  { %2883 = vmatprep.subr.bf16.mxu0 %v949_v59  ;;  %3031 = vmatprep.subr.bf16.mxu1 %v949_v59 }
 0x339   :  { %2884 = vmatpush3.bf16.msra.mxu0 %v949_v59  ;;  %3033 = vmatpush3.bf16.msra.mxu1 %v949_v59 }
 0x33a   :  { %2885 = vmatprep.subr.bf16.mxu0 %v950_v30  ;;  %3032 = vmatprep.subr.bf16.mxu1 %v950_v30 }
 0x33d   :  { %2886 = vmatpush3.bf16.msra.mxu0 %v950_v30  ;;  %3034 = vmatpush3.bf16.msra.mxu1 %v950_v30 }
 0x340   :  { %2892 = vmatmul.mubr.msk.bf16.vlgmr.msra.gmra.mrb[40].mxu1 %vm288_vm1, %v3107_v60  ;;  %2888 = vmatmul.mubr.msk.bf16.vlgmr.msra.gmra.mrb[32].mxu0 %vm288_vm1, %v3111_v0 }
 0x341   :  { %2895 = vmatprep.mubr.msk.bf16.mxu1 %vm288_vm1, %v3108_v31 }
 0x348   :  { %2896 = vmatmul.mubr.msk.bf16.gmra.mrb[44].mxu1 %vm288_vm1, %v3109_v32 }
 0x413   :  { %v3402_v33 = vpop.f32.mrb[40].mxu1  ;;  %v3404_v12 = vpop.f32.mrb[32].mxu0 }
 0x414   :  { %v1049_v13 = vpop.f32.mrb[41].mxu1  ;;  %v3406_v15 = vpop.f32.mrb[33].mxu0 }
 0x415   :  { %v3408_v9 = vpop.f32.mrb[42].mxu1  ;;  %v3410_v10 = vpop.f32.mrb[34].mxu0 }
 0x416   :  { %v1052_v14 = vpop.f32.mrb[43].mxu1  ;;  %v3412_v23 = vpop.f32.mrb[35].mxu0 }
 0x41b   :  { %v3414_v24 = vpop.f32.mrb[44].mxu1 }
 0x41c   :  { %v3416_v26 = vpop.f32.mrb[45].mxu1 }
 0x41d   :  { %1138 = vrot.lane.b32.xlu0 %v3416_v26, %s3160_s1  ;;  %v3420_v27 = vpop.f32.mrb[46].mxu1 }
 0x41e   :  { %v3422_v28 = vpop.f32.mrb[47].mxu1 }
 0x41f   :  { %1141 = vrot.lane.b32.xlu1 %v3422_v28, %s3160_s1 }
 0x421   :  { %1144 = vrot.lane.b32.xlu0 %v3414_v24, %s3160_s1 }
 0x423   :  { %1147 = vrot.lane.b32.xlu1 %v3420_v27, %s3160_s1 }
 0x425   :  { %1081 = vrot.lane.b32.xlu0 %v3406_v15, %s3160_s1 }
 0x427   :  { %1084 = vrot.lane.b32.xlu1 %v3412_v23, %s3160_s1 }
 0x429   :  { %1087 = vrot.lane.b32.xlu0 %v3404_v12, %s3160_s1 }
 0x42b   :  { %1090 = vrot.lane.b32.xlu1 %v3410_v10, %s3160_s1 }
 0x42d   :  { %1168 = vrot.lane.b32.xlu0 %v2637_v29, %s3152_s3 }
 0x48f   :  { %v1139_v35 = vpop.permute.xlu0 %1138 }
 0x490   :  { %v1140_v36 = vsel %vm1080_vm3, %v1139_v35, %v3416_v26 }
 0x491   :  { %v1142_v37 = vpop.permute.xlu1 %1141  ;;  %1150 = vrot.lane.b32.xlu1 %v1140_v36, %s3160_s1 }
 0x492   :  { %v1143_v38 = vsel %vm1080_vm3, %v1142_v37, %v3422_v28 }
 0x493   :  { %v1145_v39 = vpop.permute.xlu0 %1144  ;;  %1152 = vrot.lane.b32.xlu0 %v1143_v38, %s3160_s1 }
 0x494   :  { %v1146_v40 = vsel %vm1080_vm3, %v1145_v39, %v3414_v24 }
 0x495   :  { %v1148_v41 = vpop.permute.xlu1 %1147  ;;  %1154 = vrot.lane.b32.xlu1 %v1146_v40, %s3160_s1 }
 0x496   :  { %v1149_v42 = vsel %vm1080_vm3, %v1148_v41, %v3420_v27 }
 0x497   :  { %1156 = vrot.lane.b32.xlu0 %v1149_v42, %s3160_s1  ;;  %v1082_v43 = vpop.permute.xlu0 %1081 }
 0x498   :  { %v1083_v44 = vsel %vm1080_vm3, %v1082_v43, %v3406_v15 }
 0x499   :  { %1093 = vrot.lane.b32.xlu1 %v1083_v44, %s3160_s1  ;;  %v1085_v47 = vpop.permute.xlu1 %1084 }
 0x49a   :  { %v1086_v48 = vsel %vm1080_vm3, %v1085_v47, %v3412_v23 }
 0x49b   :  { %1095 = vrot.lane.b32.xlu0 %v1086_v48, %s3160_s1  ;;  %v1088_v54 = vpop.permute.xlu0 %1087 }
 0x49c   :  { %v1089_v55 = vsel %vm1080_vm3, %v1088_v54, %v3404_v12 }
 0x49d   :  { %1201 = vperm.xlu1 %3083, %v1195_v49   ;;  %v1091_v57 = vpop.permute.xlu1 %1090 }
 0x49e   :  { %v1092_v58 = vsel %vm1080_vm3, %v1091_v57, %v3410_v10 }
 0x49f   :  { %1206 = vperm.xlu0 %3082, %v1196_v52   ;;  %v3489_v2 = vpop.permute.xlu0 %1168 }
 0x4a1   :  { %1111 = vrot.lane.b32.xlu1 %v2636_v53, %s3165_s19 }
 0x4a3   :  { %1097 = vrot.lane.b32.xlu0 %v1089_v55, %s3160_s1 }
 0x4a5   :  { %1211 = vperm.xlu1 %3083, %v1197_v56  }
 0x4a7   :  { %1122 = vrot.lane.b32.xlu0 %v1049_v13, %s3165_s19 }
 0x4a9   :  { %1124 = vrot.lane.b32.xlu1 %v1052_v14, %s3165_s19 }
 0x4ab   :  { %1099 = vrot.lane.b32.xlu0 %v1092_v58, %s3160_s1 }
 0x4ad   :  { %1216 = vperm.xlu1 %3083, %v1198_v61  }
 0x4af   :  { %1126 = vrot.lane.b32.xlu0 %v3402_v33, %s3165_s19 }
 0x4b1   :  { %1128 = vrot.lane.b32.xlu1 %v3408_v9, %s3165_s19 }
 0x503   :  { %v1151_v3 = vpop.permute.xlu1 %1150 }
 0x504   :  { %v1158_v4 = vsel %vm1080_vm3, %v1151_v3, %v3416_v26 }
 0x505   :  { %v1171_v5 = vmul.f32 %v3489_v2, %v1158_v4  ;;  %v1153_v51 = vpop.permute.xlu0 %1152 }
 0x506   :  { %v1159_v6 = vsel %vm1080_vm3, %v1153_v51, %v3422_v28 }
 0x507   :  { %v1172_v7 = vmul.f32 %v3489_v2, %v1159_v6  ;;  %1179 = vrot.lane.b32.xlu1 %v1171_v5, %s3162_s7  ;;  %v1155_v8 = vpop.permute.xlu1 %1154 }
 0x508   :  { %v1160_v11 = vsel %vm1080_vm3, %v1155_v8, %v3414_v24 }
 0x509   :  { %v1157_v45 = vpop.permute.xlu0 %1156  ;;  %1181 = vrot.lane.b32.xlu0 %v1172_v7, %s3162_s7  ;;  %v1173_v50 = vmul.f32 %v3489_v2, %v1160_v11 }
 0x50a   :  { %v1161_v46 = vsel %vm1080_vm3, %v1157_v45, %v3420_v27 }
 0x50b   :  { %v1174_v16 = vmul.f32 %v3489_v2, %v1161_v46  ;;  %v1094_v17 = vpop.permute.xlu1 %1093 }
 0x50c   :  { %v1101_v59 = vsel %vm1080_vm3, %v1094_v17, %v3406_v15 }
 0x50d   :  { %1185 = vrot.lane.b32.xlu1 %v1174_v16, %s3162_s7  ;;  %1183 = vrot.lane.b32.xlu0 %v1173_v50, %s3162_s7  ;;  %v1096_v19 = vpop.permute.xlu0 %1095 }
 0x50e   :  { %v1102_v31 = vsel %vm1080_vm3, %v1096_v19, %v3412_v23 }
 0x51c   :  { %v1202_v18 = vpop.permute.xlu1 %1201 }
 0x51e   :  { %v1207_v62 = vpop.permute.xlu0 %1206 }
 0x520   :  { %v3507_v20 = vpop.permute.xlu1 %1111 }
 0x521   :  { %v1114_v0 = vmul.f32 %v3507_v20, %v1101_v59  ;;  %v1115_v13 = vmul.f32 %v3507_v20, %v1102_v31  ;;  %v3115_v31 = vld [vmem:[%s2558_s27 + $0x8] sm:$0xff]  }
 0x522   :  { %v1098_v1 = vpop.permute.xlu0 %1097 }
 0x523   :  { %v1103_v9 = vsel %vm1080_vm3, %v1098_v1, %v3404_v12 }
 0x524   :  { %v1212_v63 = vpop.permute.xlu1 %1211  ;;  %v1116_v28 = vmul.f32 %v3507_v20, %v1103_v9 }
 0x526   :  { %v1123_v22 = vpop.permute.xlu0 %1122 }
 0x527   :  { %v1134_v33 = vadd.f32 %v1123_v22, %v1114_v0  ;;  %v3114_v0 = vld [vmem:[%s2558_s27] sm:$0xff]   ;;  %s2561_s27 = sld [smem:[%s3824_s0 + %s3178_s24]]  }
 0x528   :  { %v1125_v21 = vpop.permute.xlu1 %1124 }
 0x529   :  { %v1135_v26 = vadd.f32 %v1125_v21, %v1115_v13 }
 0x52a   :  { %v1100_v30 = vpop.permute.xlu0 %1099 }
 0x52b   :  { %v1104_v14 = vsel %vm1080_vm3, %v1100_v30, %v3410_v10 }
 0x52c   :  { %v1217_v25 = vpop.permute.xlu1 %1216  ;;  %v1117_v29 = vmul.f32 %v3507_v20, %v1104_v14 }
 0x52e   :  { %v1127_v32 = vpop.permute.xlu0 %1126 }
 0x52f   :  { %v1136_v35 = vadd.f32 %v1127_v32, %v1116_v28 }
 0x530   :  { %v1129_v60 = vpop.permute.xlu1 %1128 }
 0x531   :  { %v1137_v36 = vadd.f32 %v1129_v60, %v1117_v29  ;;  %v3113_v60 = vld [vmem:[%s2557_s23 + $0x8] sm:$0xff]  }
 0x579   :  { %v1180_v24 = vpop.permute.xlu1 %1179 }
 0x57a   :  { %v1191_v27 = vadd.f32 %v1180_v24, %v1134_v33 }
 0x57b   :  { %v1182_v15 = vpop.permute.xlu0 %1181 }
 0x57c   :  { %v1219_v34 = vadd.f32 %v1202_v18, %v1191_v27  ;;  %v1192_v23 = vadd.f32 %v1182_v15, %v1135_v26  ;;  %v3112_v18 = vld [vmem:[%s2557_s23] sm:$0xff]   ;;  %s2550_s23 = sld [smem:[%s3824_s0 + %s3177_s20]]  }
 0x57d   :  { %2903 = vmatprep.mubr.msk.bf16.mxu1 %vm288_vm1, %v3112_v18 }
 0x57e   :  { %v1223_v37 = vmul.f32 0.2, %v1219_v34  ;;  %v1220_v38 = vadd.f32 %v1207_v62, %v1192_v23 }
 0x57f   :  { %v1184_v39 = vpop.permute.xlu0 %1183  ;;  %v1186_v40 = vpop.permute.xlu1 %1185 }
 0x580   :  { %v1227_v12 = vmax.f32 %v1219_v34, %v1223_v37  ;;  %v1224_v41 = vmul.f32 0.2, %v1220_v38  ;;  %v1193_v42 = vadd.f32 %v1184_v39, %v1136_v35  ;;  %v1194_v10 = vadd.f32 %v1186_v40, %v1137_v36  ;;  %v3116_v39 = vld [vmem:[%s2554_s4] sm:$0xff]  }
 0x581   :  { %v3117_v40 = vld [vmem:[%s2553_s8] sm:$0xff]  }
 0x582   :  { %v1231_v43 = vmul.f32 %v1227_v12, %v1227_v12  ;;  %v1228_v44 = vmax.f32 %v1220_v38, %v1224_v41  ;;  %v1221_v47 = vadd.f32 %v1212_v63, %v1193_v42  ;;  %v1222_v48 = vadd.f32 %v1217_v25, %v1194_v10  ;;  %v3119_v41 = vld [vmem:[%s2553_s8 + $0x8] sm:$0xff]  }
 0x583   :  { %v3169_v38 = vmov 0.0  }
 0x584   :  { %v1232_v49 = vmul.f32 %v1228_v44, %v1228_v44  ;;  %v1225_v52 = vmul.f32 0.2, %v1221_v47  ;;  %v1226_v53 = vmul.f32 0.2, %v1222_v48  ;;  %v1236_v54 = vsel %vm1235_vm4, %v1231_v43, 0.0  ;;  %2915 = vmatprep.subr.bf16.mxu0 %v3169_v38  ;;  %2919 = vmatprep.mubr.msk.bf16.mxu0 %vm3172_vm5, %v3169_v38 }
 0x585   :  { %2916 = vmatpush3.bf16.msra.mxu0 %v3116_v39 }
 0x586   :  { %v1237_v55 = vsel %vm1235_vm4, %v1232_v49, 0.0  ;;  %v1229_v56 = vmax.f32 %v1221_v47, %v1225_v52  ;;  %v1230_v57 = vmax.f32 %v1222_v48, %v1226_v53  ;;  %2917 = vmatprep.subr.bf16.mxu0 %v3169_v38 }
 0x587   :  { %v1238_v58 = vadd.f32 %v1237_v55, %v1236_v54 }
 0x588   :  { %v1233_v61 = vmul.f32 %v1229_v56, %v1229_v56  ;;  %v1234_v3 = vmul.f32 %v1230_v57, %v1230_v57 }
 0x58a   :  { %v1239_v4 = vsel %vm1235_vm4, %v1233_v61, 0.0  ;;  %v1241_v51 = vsel %vm1235_vm4, %v1234_v3, 0.0 }
 0x58b   :  { %v1240_v5 = vadd.f32 %v1239_v4, %v1238_v58  ;;  %v1577_v4 = vld [vmem:[%s2559_s12] sm:$0xff] }
 0x58d   :  { %v1242_v6 = vadd.f32 %v1241_v51, %v1240_v5  ;;  %v1578_v51 = vld [vmem:[%s2559_s12 + $0x8] sm:$0xff] }
 0x58f   :  { %v1243_v7 = vrot.slane %v1242_v6, 4 }
 0x591   :  { %v1244_v8 = vadd.f32 %v1243_v7, %v1242_v6 }
 0x593   :  { %v1245_v11 = vrot.slane %v1244_v8, 2 }
 0x595   :  { %v1246_v45 = vadd.f32 %v1245_v11, %v1244_v8 }
 0x597   :  { %v1247_v46 = vrot.slane %v1246_v45, 1 }
 0x599   :  { %v1248_v50 = vadd.f32 %v1247_v46, %v1246_v45 }
 0x59b   :  { %v1249_v16 = vmul.f32 0.03125, %v1248_v50 }
 0x59d   :  { %v1250_v17 = vadd.f32 1e-08, %v1249_v16 }
 0x59f   :  { %3142 = vrsqrt.f32 %v1250_v17 }
 0x5a9   :  { %v3143_v19 = vpop.eup %3142 }
 0x5aa   :  { %v1254_v62 = vmul.f32 %v3143_v19, %v1229_v56  ;;  %v1255_v63 = vmul.f32 %v3143_v19, %v1230_v57  ;;  %v1252_v1 = vmul.f32 %v3143_v19, %v1227_v12  ;;  %v1253_v21 = vmul.f32 %v3143_v19, %v1228_v44  ;;  %v3118_v12 = vld [vmem:[%s2554_s4 + $0x8] sm:$0xff]   ;;  %s3180_s4 = smov 63  }
 0x5ab   :  { %2918 = vmatpush3.bf16.msra.mxu0 %v3118_v12  ;;  %v3121_v12 = vld [vmem:[%s3589_s17 + $0x8] sm:$0xff]  }
 0x5ac   :  { %v1257_v22 = vpack.c.bf16 %v1255_v63, %v1254_v62  ;;  %v1256_v25 = vpack.c.bf16 %v1253_v21, %v1252_v1  ;;  %2931 = vmatprep.subr.bf16.mxu0 %v3169_v38 }
 0x5ae   :  { %1276 = vrot.lane.b32.xlu1 %v1257_v22, %s3168_s28  ;;  %1274 = vrot.lane.b32.xlu0 %v1256_v25, %s3168_s28 }
 0x620   :  { %v1275_v30 = vpop.permute.xlu0 %1274  ;;  %v1277_v59 = vpop.permute.xlu1 %1276 }
 0x621   :  { %2899 = vmatprep.subr.bf16.mxu1 %v1275_v30 }
 0x622   :  { %2900 = vmatpush3.bf16.msra.mxu1 %v1275_v30 }
 0x623   :  { %2901 = vmatprep.subr.bf16.mxu1 %v1277_v59 }
 0x626   :  { %2902 = vmatpush3.bf16.msra.mxu1 %v1277_v59 }
 0x627   :  { %2907 = vmatprep.subr.bf16.mxu1 %v1275_v30 }
 0x629   :  { %2904 = vmatmul.mubr.msk.bf16.vlgmr.msra.gmra.mrb[48].mxu1 %vm288_vm1, %v3113_v60 }
 0x62a   :  { %2908 = vmatpush3.bf16.msra.mxu1 %v1275_v30  ;;  %2911 = vmatprep.mubr.msk.bf16.mxu1 %vm288_vm1, %v3114_v0 }
 0x62b   :  { %2909 = vmatprep.subr.bf16.mxu1 %v1277_v59 }
 0x62e   :  { %2910 = vmatpush3.bf16.msra.mxu1 %v1277_v59 }
 0x62f   :  { %2923 = vmatprep.subr.bf16.mxu1 %v3169_v38 }
 0x631   :  { %2912 = vmatmul.mubr.msk.bf16.vlgmr.msra.gmra.mrb[52].mxu1 %vm288_vm1, %v3115_v31 }
 0x632   :  { %2924 = vmatpush3.bf16.msra.mxu1 %v3117_v40  ;;  %2927 = vmatprep.mubr.msk.bf16.mxu1 %vm3172_vm5, %v3169_v38  ;;  %v3120_v40 = vld [vmem:[%s3589_s17] sm:$0xff]  }
 0x633   :  { %2925 = vmatprep.subr.bf16.mxu1 %v3169_v38 }
 0x636   :  { %2926 = vmatpush3.bf16.msra.mxu1 %v3119_v41  ;;  %v3122_v41 = vld [vmem:[%s3589_s17 + $0x10] sm:$0xff]  }
 0x6fc   :  { %v2905_v32 = vpop.f32.mrb[48].mxu1 }
 0x6fd   :  { %v1320_v33 = vpop.f32.mrb[49].mxu1 }
 0x6fe   :  { %1404 = vrot.lane.b32.xlu0 %v1320_v33, %s3160_s1  ;;  %v2906_v13 = vpop.f32.mrb[50].mxu1 }
 0x6ff   :  { %v1323_v9 = vpop.f32.mrb[51].mxu1 }
 0x700   :  { %1407 = vrot.lane.b32.xlu1 %v1323_v9, %s3160_s1 }
 0x704   :  { %v2913_v14 = vpop.f32.mrb[52].mxu1 }
 0x705   :  { %1428 = vrot.lane.b32.xlu0 %v2913_v14, %s3160_s1  ;;  %v3536_v24 = vpop.f32.mrb[53].mxu1 }
 0x706   :  { %v2914_v26 = vpop.f32.mrb[54].mxu1 }
 0x707   :  { %1431 = vrot.lane.b32.xlu1 %v2914_v26, %s3160_s1  ;;  %v3539_v27 = vpop.f32.mrb[55].mxu1 }
 0x770   :  { %v1405_v15 = vpop.permute.xlu0 %1404 }
 0x771   :  { %v1406_v28 = vsel %vm1080_vm3, %v1405_v15, %v1320_v33 }
 0x772   :  { %v1408_v29 = vpop.permute.xlu1 %1407  ;;  %1410 = vrot.lane.b32.xlu0 %v1406_v28, %s3160_s1 }
 0x773   :  { %v1409_v34 = vsel %vm1080_vm3, %v1408_v29, %v1323_v9 }
 0x774   :  { %1412 = vrot.lane.b32.xlu1 %v1409_v34, %s3160_s1 }
 0x777   :  { %v1429_v23 = vpop.permute.xlu0 %1428 }
 0x778   :  { %v1430_v35 = vsel %vm1080_vm3, %v1429_v23, %v2913_v14 }
 0x779   :  { %1434 = vrot.lane.b32.xlu0 %v1430_v35, %s3160_s1  ;;  %v1432_v36 = vpop.permute.xlu1 %1431 }
 0x77a   :  { %v1433_v37 = vsel %vm1080_vm3, %v1432_v36, %v2914_v26 }
 0x77b   :  { %1436 = vrot.lane.b32.xlu1 %v1433_v37, %s3160_s1  ;;  %s3190_s1 = smov 13  }
 0x77d   :  { %1420 = vrot.lane.b32.xlu0 %v2905_v32, %s3165_s19 }
 0x77f   :  { %1422 = vrot.lane.b32.xlu1 %v2906_v13, %s3165_s19 }
 0x7e4   :  { %v1411_v42 = vpop.permute.xlu0 %1410 }
 0x7e5   :  { %v1414_v47 = vsel %vm1080_vm3, %v1411_v42, %v1320_v33 }
 0x7e6   :  { %v1413_v10 = vpop.permute.xlu1 %1412  ;;  %v1416_v56 = vmul.f32 %v1414_v47, %v3507_v20 }
 0x7e7   :  { %v1415_v48 = vsel %vm1080_vm3, %v1413_v10, %v1323_v9 }
 0x7e8   :  { %v1417_v57 = vmul.f32 %v1415_v48, %v3507_v20 }
 0x7eb   :  { %v1435_v43 = vpop.permute.xlu0 %1434 }
 0x7ec   :  { %v1438_v44 = vsel %vm1080_vm3, %v1435_v43, %v2913_v14 }
 0x7ed   :  { %v1440_v49 = vmul.f32 %v1438_v44, %v3489_v2  ;;  %v1437_v52 = vpop.permute.xlu1 %1436 }
 0x7ee   :  { %v1439_v53 = vsel %vm1080_vm3, %v1437_v52, %v2914_v26 }
 0x7ef   :  { %v1441_v54 = vmul.f32 %v1439_v53, %v3489_v2  ;;  %1444 = vrot.lane.b32.xlu0 %v1440_v49, %s3174_s13  ;;  %v1421_v55 = vpop.permute.xlu0 %1420 }
 0x7f0   :  { %v1426_v61 = vadd.f32 %v1421_v55, %v1416_v56 }
 0x7f1   :  { %1446 = vrot.lane.b32.xlu1 %v1441_v54, %s3174_s13  ;;  %v1423_v58 = vpop.permute.xlu1 %1422 }
 0x7f2   :  { %v1427_v3 = vadd.f32 %v1423_v58, %v1417_v57 }
 0x7f4   :  { %v1452_v5 = vpack.c.bf16 %v1427_v3, %v1426_v61 }
 0x7f5   :  { %1581 = vperm.xlu1 %3083, %v1577_v4   ;;  %v2659_v4 = vld [vmem:[%s2550_s23] ss:$0 sm:$0xff]  ;;  %s3192_s23 = smov 29  }
 0x7f6   :  { %1519 = vrot.lane.b32.xlu0 %v1452_v5, %s3168_s28  ;;  %s3179_s28 = smov 11  }
 0x7f7   :  { %s2549_s2 = sld [smem:[%s3824_s0 + %s3179_s28]]  }
 0x7fa   :  { %1586 = vperm.xlu0 %3082, %v1578_v51  }
 0x861   :  { %v1445_v2 = vpop.permute.xlu0 %1444 }
 0x862   :  { %v1450_v7 = vadd.f32 %v1445_v2, %v3536_v24 }
 0x863   :  { %v1447_v6 = vpop.permute.xlu1 %1446 }
 0x864   :  { %v1451_v8 = vadd.f32 %v1447_v6, %v3539_v27 }
 0x866   :  { %v1457_v11 = vpack.c.bf16 %v1451_v8, %v1450_v7  ;;  %v1769_v7 = vld [vmem:[%s2561_s27] sm:$0xff]  ;;  %v1770_v8 = vld [vmem:[%s2561_s27 + $0x8] sm:$0xff]  ;;  %s1_s27 = sld [smem:[%s3824_s0]]  }
 0x868   :  { %v1520_v20 = vpop.permute.xlu0 %1519  ;;  %2920 = vmatmul.mubr.msk.bf16.vlgmr.msra.gmra.mrb[36].mxu0 %vm288_vm1, %v1457_v11  ;;  %v2658_v11 = vld [vmem:[%s2549_s2] ss:$0 sm:$0xff] }
 0x869   :  { %2928 = vmatmul.mubr.msk.bf16.vlgmr.msra.gmra.mrb[56].mxu1 %vm288_vm1, %v1520_v20  ;;  %2933 = vmatprep.mubr.msk.bf16.mxu0 %vm3172_vm5, %v3169_v38 }
 0x874   :  { %v1582_v45 = vpop.permute.xlu1 %1581 }
 0x879   :  { %v1587_v25 = vpop.permute.xlu0 %1586 }
 0x93b   :  { %v1511_v46 = vpop.f32.mrb[36].mxu0 }
 0x93c   :  { %v2921_v50 = vpop.f32.mrb[37].mxu0  ;;  %v1570_v16 = vpop.f32.mrb[56].mxu1 }
 0x93d   :  { %v1571_v17 = vadd.f32 %v1570_v16, %v1511_v46  ;;  %v1514_v18 = vpop.f32.mrb[38].mxu0  ;;  %v2929_v19 = vpop.f32.mrb[57].mxu1 }
 0x93e   :  { %v2922_v62 = vpop.f32.mrb[39].mxu0  ;;  %v1573_v63 = vpop.f32.mrb[58].mxu1 }
 0x93f   :  { %v1589_v1 = vadd.f32 %v1582_v45, %v1571_v17  ;;  %v1574_v21 = vadd.f32 %v1573_v63, %v1514_v18  ;;  %v2930_v22 = vpop.f32.mrb[59].mxu1 }
 0x941   :  { %v1591_v30 = vmul.f32 %v1589_v1, %v1589_v1  ;;  %v1590_v59 = vadd.f32 %v1587_v25, %v1574_v21 }
 0x943   :  { %v1592_v60 = vmul.f32 %v1590_v59, %v1590_v59  ;;  %v1594_v0 = vsel %vm1593_vm6, %v1591_v30, 0.0 }
 0x945   :  { %v1595_v31 = vsel %vm1593_vm6, %v1592_v60, 0.0 }
 0x946   :  { %v1596_v32 = vadd.f32 %v1595_v31, %v1594_v0 }
 0x948   :  { %v1597_v33 = vrot.slane %v1596_v32, 4 }
 0x94a   :  { %v1598_v13 = vadd.f32 %v1597_v33, %v1596_v32 }
 0x94c   :  { %v1599_v9 = vrot.slane %v1598_v13, 2 }
 0x94e   :  { %v1600_v14 = vadd.f32 %v1599_v9, %v1598_v13 }
 0x950   :  { %v1601_v24 = vrot.slane %v1600_v14, 1 }
 0x952   :  { %v1602_v26 = vadd.f32 %v1601_v24, %v1600_v14 }
 0x954   :  { %v1604_v27 = vmul.f32 0.0625, %v1602_v26 }
 0x956   :  { %v1605_v15 = vadd.f32 1e-08, %v1604_v27 }
 0x958   :  { %3144 = vrsqrt.f32 %v1605_v15 }
 0x962   :  { %v3145_v28 = vpop.eup %3144 }
 0x963   :  { %v1608_v29 = vmul.f32 %v3145_v28, %v1590_v59  ;;  %v1607_v34 = vmul.f32 %v3145_v28, %v1589_v1 }
 0x965   :  { %v1610_v23 = vmul.f32 0.2, %v1608_v29  ;;  %v1609_v35 = vmul.f32 0.2, %v1607_v34 }
 0x967   :  { %v1612_v36 = vmax.f32 %v1608_v29, %v1610_v23  ;;  %v1611_v37 = vmax.f32 %v1607_v34, %v1609_v35 }
 0x969   :  { %v1619_v39 = vpack.c.bf16 %v1612_v36, %v1611_v37 }
 0x96b   :  { %2932 = vmatpush3.bf16.msra.mxu0 %v1619_v39 }
 0x96c   :  { %2957 = vmatprep.subr.bf16.mxu0 %v3169_v38 }
 0x96e   :  { %2934 = vmatmul.mubr.msk.bf16.vlgmr.msra.gmra.mrb[40].mxu0 %vm1635_vm7, %v3120_v40 }
 0x96f   :  { %2937 = vmatprep.mubr.msk.bf16.mxu0 %vm3172_vm5, %v3169_v38 }
 0x976   :  { %2938 = vmatmul.mubr.msk.bf16.gmra.mrb[44].mxu0 %vm1635_vm7, %v3121_v12 }
 0x977   :  { %2941 = vmatprep.mubr.msk.bf16.mxu0 %vm3172_vm5, %v3169_v38 }
 0x97e   :  { %2942 = vmatmul.mubr.msk.bf16.gmra.mrb[48].mxu0 %vm1635_vm7, %v3122_v41 }
 0x97f   :  { %2965 = vmatprep.mubr.msk.bf16.mxu0 %vm3172_vm5, %v3169_v38 }
 0xa41   :  { %v3606_v42 = vpop.f32.mrb[40].mxu0 }
 0xa42   :  { %v2935_v10 = vpop.f32.mrb[41].mxu0 }
 0xa43   :  { %v3608_v43 = vpop.f32.mrb[42].mxu0 }
 0xa44   :  { %v2936_v44 = vpop.f32.mrb[43].mxu0 }
 0xa49   :  { %v1687_v47 = vpop.f32.mrb[44].mxu0 }
 0xa4a   :  { %v2939_v48 = vpop.f32.mrb[45].mxu0 }
 0xa4b   :  { %v1690_v49 = vpop.f32.mrb[46].mxu0 }
 0xa4c   :  { %v2940_v52 = vpop.f32.mrb[47].mxu0 }
 0xa51   :  { %v1695_v53 = vpop.f32.mrb[48].mxu0 }
 0xa52   :  { %1736 = vrot.lane.b32.xlu1 %v1695_v53, %s3176_s18  ;;  %v2943_v54 = vpop.f32.mrb[49].mxu0 }
 0xa53   :  { %v1698_v55 = vpop.f32.mrb[50].mxu0 }
 0xa54   :  { %1739 = vrot.lane.b32.xlu0 %v1698_v55, %s3176_s18  ;;  %v2944_v56 = vpop.f32.mrb[51].mxu0 }
 0xa55   :  { %v3125_v56 = vld [vmem:[%s2563_s14] sm:$0xff]  }
 0xa56   :  { %1703 = vrot.lane.b32.xlu1 %v3606_v42, %s3176_s18 }
 0xa58   :  { %1706 = vrot.lane.b32.xlu0 %v3608_v43, %s3176_s18 }
 0xac4   :  { %v1737_v57 = vpop.permute.xlu1 %1736 }
 0xac5   :  { %v1738_v58 = vsel %vm1702_vm8, %v1737_v57, %v1695_v53  ;;  %v3126_v57 = vld [vmem:[%s2563_s14 + $0x8] sm:$0xff]   ;;  %s2551_s14 = sld [smem:[%s3824_s0 + %s3190_s1]]  }
 0xac6   :  { %1742 = vrot.lane.b32.xlu1 %v1738_v58, %s3176_s18  ;;  %v1740_v61 = vpop.permute.xlu0 %1739 }
 0xac7   :  { %v1741_v3 = vsel %vm1702_vm8, %v1740_v61, %v1698_v55 }
 0xac8   :  { %v1704_v5 = vpop.permute.xlu1 %1703  ;;  %1744 = vrot.lane.b32.xlu0 %v1741_v3, %s3176_s18 }
 0xac9   :  { %v1705_v2 = vsel %vm1702_vm8, %v1704_v5, %v3606_v42 }
 0xaca   :  { %1754 = vrot.lane.b32.xlu1 %v2659_v4, %s3152_s3  ;;  %v1707_v51 = vpop.permute.xlu0 %1706 }
 0xacb   :  { %v1708_v6 = vsel %vm1702_vm8, %v1707_v51, %v3608_v43 }
 0xacc   :  { %1709 = vrot.lane.b32.xlu0 %v1705_v2, %s3176_s18 }
 0xace   :  { %1711 = vrot.lane.b32.xlu1 %v1708_v6, %s3176_s18 }
 0xad0   :  { %1773 = vperm.xlu0 %3082, %v1769_v7  }
 0xad2   :  { %1778 = vperm.xlu1 %3083, %v1770_v8  }
 0xad4   :  { %1721 = vrot.lane.b32.xlu0 %v2658_v11, %s3180_s4 }
 0xad6   :  { %1728 = vrot.lane.b32.xlu1 %v1687_v47, %s3180_s4 }
 0xad8   :  { %1730 = vrot.lane.b32.xlu0 %v1690_v49, %s3180_s4 }
 0xb38   :  { %v1743_v20 = vpop.permute.xlu1 %1742 }
 0xb39   :  { %v1746_v50 = vsel %vm1702_vm8, %v1743_v20, %v1695_v53 }
 0xb3a   :  { %v1745_v45 = vpop.permute.xlu0 %1744 }
 0xb3b   :  { %v1747_v46 = vsel %vm1702_vm8, %v1745_v45, %v1698_v55  ;;  %v3124_v55 = vld [vmem:[%s2562_s9 + $0x8] sm:$0xff]  }
 0xb3c   :  { %v3641_v16 = vpop.permute.xlu1 %1754 }
 0xb3d   :  { %v1757_v17 = vmul.f32 %v3641_v16, %v1746_v50  ;;  %v1758_v18 = vmul.f32 %v3641_v16, %v1747_v46 }
 0xb3e   :  { %v1710_v19 = vpop.permute.xlu0 %1709 }
 0xb3f   :  { %1761 = vrot.lane.b32.xlu1 %v1757_v17, %s3181_s5  ;;  %1763 = vrot.lane.b32.xlu0 %v1758_v18, %s3181_s5  ;;  %v1713_v22 = vsel %vm1702_vm8, %v1710_v19, %v3606_v42  ;;  %v3123_v42 = vld [vmem:[%s2562_s9] sm:$0xff]   ;;  %s3189_s5 = smov 27  }
 0xb40   :  { %v1712_v63 = vpop.permute.xlu1 %1711  ;;  %2947 = vmatprep.mubr.msk.bf16.mxu1 %vm1635_vm7, %v3123_v42  ;;  %v3697_v18 = vld [vmem:[%s2556_s21] sm:$0xff]   ;;  %s3757_s8 = sld [smem:[%s3824_s0 + %s3189_s5]]  }
 0xb41   :  { %v1714_v30 = vsel %vm1702_vm8, %v1712_v63, %v3608_v43  ;;  %v3699_v19 = vld [vmem:[%s2555_s25] sm:$0xff]   ;;  %2958 = vmatpush3.bf16.msra.mxu0 %v3697_v18  ;;  %v3706_v63 = vld [vmem:[%s2555_s25 + $0x8] sm:$0xff]  }
 0xb42   :  { %2959 = vmatprep.subr.bf16.mxu0 %v3169_v38 }
 0xb4f   :  { %v1774_v62 = vpop.permute.xlu0 %1773 }
 0xb51   :  { %v1779_v1 = vpop.permute.xlu1 %1778 }
 0xb53   :  { %v3645_v21 = vpop.permute.xlu0 %1721 }
 0xb54   :  { %v1724_v25 = vmul.f32 %v3645_v21, %v1713_v22  ;;  %v1725_v0 = vmul.f32 %v3645_v21, %v1714_v30  ;;  %v3717_v22 = vld [vmem:[%s2555_s25 + $0x10] sm:$0xff]   ;;  %v3723_v30 = vld [vmem:[%s2555_s25 + $0x18] sm:$0xff]  }
 0xb55   :  { %v1729_v59 = vpop.permute.xlu1 %1728 }
 0xb56   :  { %v1734_v31 = vadd.f32 %v1729_v59, %v1724_v25  ;;  %v3720_v25 = vld [vmem:[%s2556_s21 + $0x18] sm:$0xff]  }
 0xb57   :  { %v1731_v60 = vpop.permute.xlu0 %1730 }
 0xb58   :  { %v1735_v32 = vadd.f32 %v1731_v60, %v1725_v0 }
 0xbb1   :  { %v1762_v33 = vpop.permute.xlu1 %1761  ;;  %v1764_v13 = vpop.permute.xlu0 %1763 }
 0xbb2   :  { %v1767_v9 = vadd.f32 %v1762_v33, %v1734_v31  ;;  %v1768_v14 = vadd.f32 %v1764_v13, %v1735_v32 }
 0xbb4   :  { %v1781_v24 = vadd.f32 %v1774_v62, %v1767_v9  ;;  %v1782_v26 = vadd.f32 %v1779_v1, %v1768_v14  ;;  %v3702_v62 = vld [vmem:[%s2556_s21 + $0x8] sm:$0xff]   ;;  %v3709_v1 = vld [vmem:[%s2556_s21 + $0x10] sm:$0xff]  }
 0xbb5   :  { %2960 = vmatpush3.bf16.msra.mxu0 %v3702_v62 }
 0xbb6   :  { %v1783_v27 = vmul.f32 %v1781_v24, %v1781_v24  ;;  %v1784_v15 = vmul.f32 %v1782_v26, %v1782_v26  ;;  %2961 = vmatprep.subr.bf16.mxu0 %v3169_v38 }
 0xbb8   :  { %v1786_v28 = vsel %vm1785_vm9, %v1783_v27, 0.0  ;;  %v1787_v29 = vsel %vm1785_vm9, %v1784_v15, 0.0 }
 0xbb9   :  { %v1788_v34 = vadd.f32 %v1787_v29, %v1786_v28  ;;  %2962 = vmatpush3.bf16.msra.mxu0 %v3709_v1 }
 0xbba   :  { %2963 = vmatprep.subr.bf16.mxu0 %v3169_v38 }
 0xbbb   :  { %v1789_v23 = vrot.slane %v1788_v34, 4 }
 0xbbd   :  { %v1790_v35 = vadd.f32 %v1789_v23, %v1788_v34  ;;  %2964 = vmatpush3.bf16.msra.mxu0 %v3720_v25 }
 0xbbe   :  { %2981 = vmatprep.subr.bf16.mxu0 %v3169_v38 }
 0xbbf   :  { %v1791_v36 = vrot.slane %v1790_v35, 2 }
 0xbc1   :  { %v1792_v37 = vadd.f32 %v1791_v36, %v1790_v35 }
 0xbc3   :  { %v1793_v39 = vrot.slane %v1792_v37, 1 }
 0xbc5   :  { %v1794_v40 = vadd.f32 %v1793_v39, %v1792_v37 }
 0xbc7   :  { %v1795_v12 = vmul.f32 0.0625, %v1794_v40 }
 0xbc9   :  { %v1796_v41 = vadd.f32 1e-08, %v1795_v12 }
 0xbcb   :  { %3146 = vrsqrt.f32 %v1796_v41 }
 0xbd5   :  { %v3147_v10 = vpop.eup %3146 }
 0xbd6   :  { %v1799_v43 = vmul.f32 %v3147_v10, %v1782_v26  ;;  %v1798_v44 = vmul.f32 %v3147_v10, %v1781_v24 }
 0xbd8   :  { %v1801_v47 = vmul.f32 0.2, %v1799_v43  ;;  %v1800_v48 = vmul.f32 0.2, %v1798_v44 }
 0xbda   :  { %v1802_v49 = vmax.f32 %v1798_v44, %v1800_v48  ;;  %v1803_v52 = vmax.f32 %v1799_v43, %v1801_v47 }
 0xbdc   :  { %v1804_v53 = vpack.c.bf16 %v1803_v52, %v1802_v49 }
 0xbde   :  { %1820 = vrot.lane.b32.xlu1 %v1804_v53, %s3184_s15 }
 0xc50   :  { %v3661_v54 = vpop.permute.xlu1 %1820 }
 0xc51   :  { %2945 = vmatprep.subr.bf16.mxu1 %v3661_v54 }
 0xc52   :  { %2946 = vmatpush3.bf16.msra.mxu1 %v3661_v54 }
 0xc53   :  { %2951 = vmatprep.subr.bf16.mxu1 %v3661_v54 }
 0xc55   :  { %2948 = vmatmul.mubr.msk.bf16.vlgmr.msra.gmra.mrb[60].mxu1 %vm1635_vm7, %v3124_v55 }
 0xc56   :  { %2952 = vmatpush3.bf16.msra.mxu1 %v3661_v54  ;;  %2953 = vmatprep.mubr.msk.bf16.mxu1 %vm1635_vm7, %v3125_v56 }
 0xc57   :  { %2969 = vmatprep.subr.bf16.mxu1 %v3169_v38 }
 0xc5d   :  { %2954 = vmatmul.mubr.msk.bf16.vlgmr.msra.gmra.mrb[64].mxu1 %vm1635_vm7, %v3126_v57 }
 0xc5e   :  { %2977 = vmatprep.mubr.msk.bf16.mxu1 %vm3172_vm5, %v3169_v38  ;;  %2970 = vmatpush3.bf16.msra.mxu1 %v3699_v19 }
 0xc5f   :  { %2971 = vmatprep.subr.bf16.mxu1 %v3169_v38 }
 0xc62   :  { %2972 = vmatpush3.bf16.msra.mxu1 %v3706_v63 }
 0xc63   :  { %2973 = vmatprep.subr.bf16.mxu1 %v3169_v38 }
 0xc66   :  { %2974 = vmatpush3.bf16.msra.mxu1 %v3717_v22 }
 0xc67   :  { %2975 = vmatprep.subr.bf16.mxu1 %v3169_v38 }
 0xc6a   :  { %2976 = vmatpush3.bf16.msra.mxu1 %v3723_v30 }
 0xc6b   :  { %2995 = vmatprep.subr.bf16.mxu1 %v3169_v38 }
 0xd28   :  { %v2949_v58 = vpop.f32.mrb[60].mxu1 }
 0xd29   :  { %v1863_v61 = vpop.f32.mrb[61].mxu1 }
 0xd2a   :  { %1947 = vrot.lane.b32.xlu0 %v1863_v61, %s3176_s18  ;;  %v2950_v3 = vpop.f32.mrb[62].mxu1 }
 0xd2b   :  { %v1866_v4 = vpop.f32.mrb[63].mxu1 }
 0xd2c   :  { %1950 = vrot.lane.b32.xlu1 %v1866_v4, %s3176_s18 }
 0xd30   :  { %v2955_v5 = vpop.f32.mrb[64].mxu1 }
 0xd31   :  { %1971 = vrot.lane.b32.xlu0 %v2955_v5, %s3176_s18  ;;  %v3676_v51 = vpop.f32.mrb[65].mxu1 }
 0xd32   :  { %v2956_v2 = vpop.f32.mrb[66].mxu1 }
 0xd33   :  { %1974 = vrot.lane.b32.xlu1 %v2956_v2, %s3176_s18  ;;  %v3679_v6 = vpop.f32.mrb[67].mxu1 }
 0xd9c   :  { %v1948_v7 = vpop.permute.xlu0 %1947 }
 0xd9d   :  { %v1949_v8 = vsel %vm1702_vm8, %v1948_v7, %v1863_v61 }
 0xd9e   :  { %v1951_v11 = vpop.permute.xlu1 %1950  ;;  %1953 = vrot.lane.b32.xlu0 %v1949_v8, %s3176_s18 }
 0xd9f   :  { %v1952_v20 = vsel %vm1702_vm8, %v1951_v11, %v1866_v4 }
 0xda0   :  { %1955 = vrot.lane.b32.xlu1 %v1952_v20, %s3176_s18 }
 0xda3   :  { %v1972_v45 = vpop.permute.xlu0 %1971 }
 0xda4   :  { %v1973_v46 = vsel %vm1702_vm8, %v1972_v45, %v2955_v5 }
 0xda5   :  { %1977 = vrot.lane.b32.xlu0 %v1973_v46, %s3176_s18  ;;  %v1975_v50 = vpop.permute.xlu1 %1974 }
 0xda6   :  { %v1976_v17 = vsel %vm1702_vm8, %v1975_v50, %v2956_v2 }
 0xda7   :  { %1979 = vrot.lane.b32.xlu1 %v1976_v17, %s3176_s18  ;;  %s3187_s18 = smov 26  }
 0xda8   :  { %s2564_s28 = sld [smem:[%s3824_s0 + %s3187_s18]]  }
 0xda9   :  { %1963 = vrot.lane.b32.xlu0 %v2949_v58, %s3180_s4  ;;  %s2567_s18 = sld [smem:[%s3824_s0 + %s3192_s23]]  }
 0xdab   :  { %1965 = vrot.lane.b32.xlu1 %v2950_v3, %s3180_s4  ;;  %s2566_s4 = sld [smem:[%s3824_s0 + %s3188_s29]]   ;;  %s3193_s29 = smov 33  }
 0xdae   :  { %v2152_v23 = vld [vmem:[%s2564_s28] sm:$0xff]  ;;  %v2153_v37 = vld [vmem:[%s2564_s28 + $0x8] sm:$0xff]  ;;  %s2530_s28 = ssub.f32 1.0, %s1_s27 }
 0xdb1   :  { %v2302_v36 = vld [vmem:[%s2566_s4] sm:$0xff] }
 0xe10   :  { %v1954_v59 = vpop.permute.xlu0 %1953 }
 0xe11   :  { %v1957_v32 = vsel %vm1702_vm8, %v1954_v59, %v1863_v61 }
 0xe12   :  { %v1956_v60 = vpop.permute.xlu1 %1955  ;;  %v1959_v27 = vmul.f32 %v1957_v32, %v3645_v21 }
 0xe13   :  { %v1958_v33 = vsel %vm1702_vm8, %v1956_v60, %v1866_v4 }
 0xe14   :  { %v1960_v15 = vmul.f32 %v1958_v33, %v3645_v21 }
 0xe17   :  { %v1978_v0 = vpop.permute.xlu0 %1977 }
 0xe18   :  { %v1981_v31 = vsel %vm1702_vm8, %v1978_v0, %v2955_v5 }
 0xe19   :  { %v1983_v13 = vmul.f32 %v1981_v31, %v3641_v16  ;;  %v1980_v9 = vpop.permute.xlu1 %1979 }
 0xe1a   :  { %v1982_v14 = vsel %vm1702_vm8, %v1980_v9, %v2956_v2  ;;  %v3136_v9 = vld [vmem:[%s3757_s8 + $0x8] sm:$0xff]  }
 0xe1b   :  { %v1984_v24 = vmul.f32 %v1982_v14, %v3641_v16  ;;  %1987 = vrot.lane.b32.xlu0 %v1983_v13, %s3174_s13  ;;  %v1964_v26 = vpop.permute.xlu0 %1963  ;;  %v2303_v16 = vld [vmem:[%s2566_s4 + $0x8] sm:$0xff]  ;;  %v3135_v13 = vld [vmem:[%s3757_s8] sm:$0xff]   ;;  %v3137_v14 = vld [vmem:[%s3757_s8 + $0x10] sm:$0xff]   ;;  %s2571_s4 = sld [smem:[%s3824_s0 + %s3193_s29]]  }
 0xe1c   :  { %v1969_v29 = vadd.f32 %v1964_v26, %v1959_v27 }
 0xe1d   :  { %1989 = vrot.lane.b32.xlu1 %v1984_v24, %s3174_s13  ;;  %v1966_v28 = vpop.permute.xlu1 %1965 }
 0xe1e   :  { %v1970_v34 = vadd.f32 %v1966_v28, %v1960_v15 }
 0xe20   :  { %v1995_v35 = vpack.c.bf16 %v1970_v34, %v1969_v29 }
 0xe21   :  { %2156 = vperm.xlu1 %3083, %v2152_v23  }
 0xe22   :  { %2082 = vrot.lane.b32.xlu0 %v1995_v35, %s3184_s15  ;;  %v2390_v35 = vld [vmem:[#allocation3] sm:$0x1]  ;;  %s3191_s15 = smov 14  }
 0xe23   :  { %s2552_s20 = sld [smem:[%s3824_s0 + %s3191_s15]]  }
 0xe25   :  { %2306 = vperm.xlu1 %3083, %v2302_v36  }
 0xe26   :  { %2161 = vperm.xlu0 %3082, %v2153_v37  }
 0xe2a   :  { %2311 = vperm.xlu0 %3082, %v2303_v16  }
 0xe8d   :  { %v1988_v39 = vpop.permute.xlu0 %1987 }
 0xe8e   :  { %v1993_v21 = vadd.f32 %v1988_v39, %v3676_v51 }
 0xe8f   :  { %v1990_v40 = vpop.permute.xlu1 %1989 }
 0xe90   :  { %v1994_v12 = vadd.f32 %v1990_v40, %v3679_v6  ;;  %v2684_v40 = vld [vmem:[%s2551_s14] ss:$0 sm:$0xff] }
 0xe92   :  { %v2004_v41 = vpack.c.bf16 %v1994_v12, %v1993_v21 }
 0xe94   :  { %v2083_v42 = vpop.permute.xlu0 %2082  ;;  %2966 = vmatmul.mubr.msk.bf16.vlgmr.msra.gmra.mrb[52].mxu0 %vm1593_vm6, %v2004_v41 }
 0xe95   :  { %2978 = vmatmul.mubr.msk.bf16.vlgmr.msra.gmra.mrb[68].mxu1 %vm1593_vm6, %v2083_v42  ;;  %2983 = vmatprep.mubr.msk.bf16.mxu0 %vm3172_vm5, %v3169_v38  ;;  %v2685_v42 = vld [vmem:[%s2552_s20] ss:$0 sm:$0xff] }
 0xe96   :  { %2997 = vmatprep.mubr.msk.bf16.mxu1 %vm3172_vm5, %v3169_v38 }
 0xea0   :  { %v2157_v10 = vpop.permute.xlu1 %2156 }
 0xea4   :  { %v2307_v16 = vpop.permute.xlu1 %2306 }
 0xea5   :  { %v2162_v61 = vpop.permute.xlu0 %2161 }
 0xea9   :  { %v2312_v39 = vpop.permute.xlu0 %2311 }
 0xf67   :  { %v2074_v43 = vpop.f32.mrb[52].mxu0 }
 0xf68   :  { %v2967_v44 = vpop.f32.mrb[53].mxu0  ;;  %v2145_v47 = vpop.f32.mrb[68].mxu1 }
 0xf69   :  { %v2146_v48 = vadd.f32 %v2145_v47, %v2074_v43  ;;  %v2077_v49 = vpop.f32.mrb[54].mxu0  ;;  %v2979_v52 = vpop.f32.mrb[69].mxu1 }
 0xf6a   :  { %v2968_v53 = vpop.f32.mrb[55].mxu0  ;;  %v2148_v55 = vpop.f32.mrb[70].mxu1 }
 0xf6b   :  { %v2164_v56 = vadd.f32 %v2157_v10, %v2146_v48  ;;  %v2149_v57 = vadd.f32 %v2148_v55, %v2077_v49  ;;  %v2980_v58 = vpop.f32.mrb[71].mxu1 }
 0xf6d   :  { %v2165_v3 = vadd.f32 %v2162_v61, %v2149_v57  ;;  %v2166_v4 = vmul.f32 %v2164_v56, %v2164_v56 }
 0xf6f   :  { %v2167_v5 = vmul.f32 %v2165_v3, %v2165_v3 }
 0xf71   :  { %v2168_v51 = vadd.f32 %v2167_v5, %v2166_v4 }
 0xf73   :  { %v2169_v2 = vrot.slane %v2168_v51, 4 }
 0xf75   :  { %v2170_v6 = vadd.f32 %v2169_v2, %v2168_v51 }
 0xf77   :  { %v2171_v7 = vrot.slane %v2170_v6, 2 }
 0xf79   :  { %v2172_v8 = vadd.f32 %v2171_v7, %v2170_v6 }
 0xf7b   :  { %v2173_v11 = vrot.slane %v2172_v8, 1 }
 0xf7d   :  { %v2174_v20 = vadd.f32 %v2173_v11, %v2172_v8 }
 0xf7f   :  { %v2175_v45 = vmul.f32 0.0625, %v2174_v20 }
 0xf81   :  { %v2176_v46 = vadd.f32 1e-08, %v2175_v45 }
 0xf83   :  { %3148 = vrsqrt.f32 %v2176_v46 }
 0xf8d   :  { %v3149_v50 = vpop.eup %3148 }
 0xf8e   :  { %v2179_v17 = vmul.f32 %v3149_v50, %v2165_v3  ;;  %v2178_v59 = vmul.f32 %v3149_v50, %v2164_v56 }
 0xf90   :  { %v2181_v60 = vmul.f32 0.2, %v2179_v17  ;;  %v2180_v0 = vmul.f32 0.2, %v2178_v59 }
 0xf92   :  { %v2183_v31 = vmax.f32 %v2179_v17, %v2181_v60  ;;  %v2182_v32 = vmax.f32 %v2178_v59, %v2180_v0 }
 0xf94   :  { %v2190_v33 = vpack.c.bf16 %v2183_v31, %v2182_v32  ;;  %v2334_v31 = vld [vmem:[%s2569_s22] sm:$0x1] }
 0xf95   :  { %v2389_v32 = vld [vmem:[%s2567_s18] sm:$0x1] }
 0xf96   :  { %2982 = vmatpush3.bf16.msra.mxu0 %v2190_v33  ;;  %v2342_v33 = vlaneseq }
 0xf97   :  { %3007 = vmatprep.subr.bf16.mxu0 %v3169_v38 }
 0xf99   :  { %2984 = vmatmul.mubr.msk.bf16.vlgmr.msra.gmra.mrb[56].mxu0 %vm1635_vm7, %v3135_v13  ;;  %v2343_v13 = vshrl.u32 %v2342_v33, 7 }
 0xf9a   :  { %2987 = vmatprep.mubr.msk.bf16.mxu0 %vm3172_vm5, %v3169_v38  ;;  %3008 = vmatpush3.bf16.msra.mxu0 %v3697_v18  ;;  %v75_v18 = vstv %s2570_s11 }
 0xf9b   :  { %3009 = vmatprep.subr.bf16.mxu0 %v3169_v38  ;;  %76 = vst [vmem:[#allocation4] sm:$0x1] %v75_v18 }
 0xf9e   :  { %3010 = vmatpush3.bf16.msra.mxu0 %v3702_v62 }
 0xf9f   :  { %3011 = vmatprep.subr.bf16.mxu0 %v3169_v38 }
 0xfa1   :  { %2988 = vmatmul.mubr.msk.bf16.gmra.mrb[60].mxu0 %vm1635_vm7, %v3136_v9 }
 0xfa2   :  { %2991 = vmatprep.mubr.msk.bf16.mxu0 %vm3172_vm5, %v3169_v38  ;;  %3012 = vmatpush3.bf16.msra.mxu0 %v3709_v1  ;;  %v2336_v37 = vld [vmem:[#allocation4] sm:$0x1] }
 0xfa3   :  { %3013 = vmatprep.subr.bf16.mxu0 %v3169_v38 }
 0xfa6   :  { %3014 = vmatpush3.bf16.msra.mxu0 %v3720_v25 }
 0xfa7   :  { %3019 = vmatprep.subr.bf16.mxu0 %v3169_v38 }
 0xfa9   :  { %2992 = vmatmul.mubr.msk.bf16.gmra.mrb[64].mxu0 %vm1635_vm7, %v3137_v14  ;;  %v2344_v14 = vsub.s32 0, %v2343_v13 }
 0xfaa   :  { %3015 = vmatprep.mubr.msk.bf16.mxu0 %vm3172_vm5, %v3169_v38 }
0x106c   :  { %v2249_v62 = vpop.f32.mrb[56].mxu0 }
0x106d   :  { %2272 = vrot.lane.b32.xlu1 %v2249_v62, %s3152_s3  ;;  %v2985_v1 = vpop.f32.mrb[57].mxu0 }
0x106e   :  { %v2252_v24 = vpop.f32.mrb[58].mxu0 }
0x106f   :  { %2274 = vrot.lane.b32.xlu0 %v2252_v24, %s3152_s3  ;;  %v2986_v25 = vpop.f32.mrb[59].mxu0 }
0x1074   :  { %v2257_v26 = vpop.f32.mrb[60].mxu0 }
0x1075   :  { %v2989_v27 = vpop.f32.mrb[61].mxu0 }
0x1076   :  { %v2260_v15 = vpop.f32.mrb[62].mxu0 }
0x1077   :  { %v2990_v28 = vpop.f32.mrb[63].mxu0 }
0x107c   :  { %v2265_v29 = vpop.f32.mrb[64].mxu0 }
0x107d   :  { %2287 = vrot.lane.b32.xlu1 %v2265_v29, %s3174_s13  ;;  %v2993_v34 = vpop.f32.mrb[65].mxu0 }
0x107e   :  { %v2268_v23 = vpop.f32.mrb[66].mxu0 }
0x107f   :  { %2289 = vrot.lane.b32.xlu0 %v2268_v23, %s3174_s13  ;;  %v2994_v36 = vpop.f32.mrb[67].mxu0 }
0x1081   :  { %2393 = vperm.xlu1 %3083, %v2390_v35  }
0x1083   :  { %2339 = vperm.xlu0 %3082, %v2336_v37  }
0x10df   :  { %v2273_v21 = vpop.permute.xlu1 %2272 }
0x10e0   :  { %v2283_v41 = vmul.f32 %v2684_v40, %v2273_v21 }
0x10e1   :  { %v2275_v12 = vpop.permute.xlu0 %2274 }
0x10e2   :  { %v2284_v10 = vmul.f32 %v2684_v40, %v2275_v12  ;;  %v2285_v44 = vadd.f32 %v2283_v41, %v2257_v26 }
0x10e4   :  { %v2286_v49 = vadd.f32 %v2284_v10, %v2260_v15 }
0x10ef   :  { %v2288_v43 = vpop.permute.xlu1 %2287 }
0x10f0   :  { %v2298_v47 = vmul.f32 %v2685_v42, %v2288_v43 }
0x10f1   :  { %v2290_v48 = vpop.permute.xlu0 %2289 }
0x10f2   :  { %v2300_v52 = vadd.f32 %v2298_v47, %v2285_v44  ;;  %v2299_v53 = vmul.f32 %v2685_v42, %v2290_v48 }
0x10f4   :  { %v2314_v55 = vadd.f32 %v2307_v16, %v2300_v52  ;;  %v2301_v56 = vadd.f32 %v2299_v53, %v2286_v49 }
0x10f6   :  { %v2315_v57 = vadd.f32 %v2312_v39, %v2301_v56  ;;  %v2316_v58 = vmul.f32 %v2314_v55, %v2314_v55 }
0x10f8   :  { %v2317_v61 = vmul.f32 %v2315_v57, %v2315_v57 }
0x10fa   :  { %v2318_v3 = vadd.f32 %v2317_v61, %v2316_v58 }
0x10fc   :  { %v2319_v4 = vrot.slane %v2318_v3, 4 }
0x10fe   :  { %v2320_v5 = vadd.f32 %v2319_v4, %v2318_v3 }
0x1100   :  { %v2321_v51 = vrot.slane %v2320_v5, 2  ;;  %v2394_v27 = vpop.permute.xlu1 %2393 }
0x1101   :  { %v2399_v15 = vrot.slane %v2394_v27, %v2344_v14 }
0x1102   :  { %v2322_v2 = vadd.f32 %v2321_v51, %v2320_v5  ;;  %v2340_v9 = vpop.permute.xlu0 %2339 }
0x1103   :  { %v2345_v18 = vrot.slane %v2340_v9, %v2344_v14 }
0x1104   :  { %v2323_v6 = vrot.slane %v2322_v2, 1 }
0x1106   :  { %v2324_v7 = vadd.f32 %v2323_v6, %v2322_v2 }
0x1108   :  { %v2325_v8 = vmul.f32 0.0625, %v2324_v7 }
0x110a   :  { %v2326_v11 = vadd.f32 1e-08, %v2325_v8 }
0x110c   :  { %3150 = vrsqrt.f32 %v2326_v11 }
0x1116   :  { %v3151_v20 = vpop.eup %3150 }
0x1117   :  { %v2329_v45 = vmul.f32 %v3151_v20, %v2315_v57  ;;  %v2328_v46 = vmul.f32 %v3151_v20, %v2314_v55 }
0x1119   :  { %v2331_v50 = vmul.f32 0.2, %v2329_v45  ;;  %v2330_v17 = vmul.f32 0.2, %v2328_v46 }
0x111b   :  { %v2333_v59 = vmax.f32 %v2329_v45, %v2331_v50  ;;  %v2332_v60 = vmax.f32 %v2328_v46, %v2330_v17 }
0x111d   :  { %v2335_v0 = vpack.c.bf16 %v2333_v59, %v2332_v60 }
0x111f   :  { %2996 = vmatpush3.bf16.msra.mxu1 %v2335_v0 }
0x1120   :  { %3001 = vmatprep.subr.bf16.mxu1 %v3169_v38 }
0x1122   :  { %2998 = vmatmul.mubr.msk.bf16.vlgmr.msra.gmra.mrb[72].mxu1 %vm1635_vm7, %v2334_v31 }
0x1123   :  { %3002 = vmatpush3.bf16.msra.mxu1 %v3661_v54  ;;  %3003 = vmatprep.mubr.msk.bf16.mxu1 %vm3172_vm5, %v3169_v38 }
0x112a   :  { %3004 = vmatmul.mubr.msk.bf16.vlgmr.msra.gmra.mrb[76].mxu1 %vm1635_vm7, %v2389_v32 }
0x11f5   :  { %v2383_v62 = vpop.f32.mrb[72].mxu1 }
0x11f6   :  { %v2384_v1 = vadd.f32 %v2383_v62, %v2345_v18  ;;  %v2999_v24 = vpop.f32.mrb[73].mxu1 }
0x11f7   :  { %v2386_v25 = vpop.f32.mrb[74].mxu1 }
0x11f8   :  { %v3000_v26 = vpop.f32.mrb[75].mxu1 }
0x11fd   :  { %v2437_v28 = vpop.f32.mrb[76].mxu1 }
0x11fe   :  { %v2438_v54 = vadd.f32 %v2437_v28, %v2399_v15  ;;  %v3005_v29 = vpop.f32.mrb[77].mxu1 }
0x11ff   :  { %v2440_v34 = vpop.f32.mrb[78].mxu1 }
0x1200   :  { %v2443_v23 = vpack.c.bf16 %v2438_v54, %v2438_v54  ;;  %v3006_v35 = vpop.f32.mrb[79].mxu1 }
0x1202   :  { %3016 = vmatmul.mubr.msk.bf16.vlgmr.msra.gmra.mrb[68].mxu0 %vm1593_vm6, %v2443_v23 }
0x1203   :  { %3020 = vmatpush3.bf16.msra.mxu0 %v3699_v19  ;;  %3027 = vmatprep.mubr.msk.bf16.mxu0 %vm3172_vm5, %v3169_v38  ;;  %v2528_v19 = vstv %s1_s27 }
0x1204   :  { %3021 = vmatprep.subr.bf16.mxu0 %v3169_v38 }
0x1207   :  { %3022 = vmatpush3.bf16.msra.mxu0 %v3706_v63  ;;  %v2531_v63 = vstv %s2530_s28 }
0x1208   :  { %3023 = vmatprep.subr.bf16.mxu0 %v3169_v38 }
0x120b   :  { %3024 = vmatpush3.bf16.msra.mxu0 %v3717_v22  ;;  %v2529_v22 = vmul.f32 %v2528_v19, %v2384_v1 }
0x120c   :  { %3025 = vmatprep.subr.bf16.mxu0 %v3169_v38 }
0x120f   :  { %3026 = vmatpush3.bf16.msra.mxu0 %v3723_v30 }
0x1212   :  { %3028 = vmatmul.mubr.msk.bf16.vlgmr.msra.gmra.mrb[68].mxu0 %vm1593_vm6, %v2443_v23 }
0x12e5   :  { %v2521_v36 = vpop.f32.mrb[68].mxu0 }
0x12e6   :  { %v2532_v37 = vmul.f32 %v2531_v63, %v2521_v36  ;;  %v3029_v38 = vpop.f32.mrb[69].mxu0 }
0x12e7   :  { %v2524_v16 = vpop.f32.mrb[70].mxu0 }
0x12e8   :  { %v2533_v30 = vadd.f32 %v2532_v37, %v2529_v22  ;;  %v3030_v39 = vpop.f32.mrb[71].mxu0 }
0x12ea   :  { %2534 = vst [vmem:[%s2571_s4] sm:$0x1] %v2533_v30 }

</bundles_post_ra>
